<compile_context>
chip_gen: v6e
topology: v6e:2x2x1
jax: 0.10.0
libtpu: 0.0.40
codegen_flags: <defaults>
</compile_context>

<pallas_src>
import functools

import jax
import jax.numpy as jnp
from jax.experimental import pallas as pl
from jax.experimental.pallas import tpu as pltpu


# ---------------------------------------------------------------------------
# Kernel
# ---------------------------------------------------------------------------
def gru_block_kernel(
    x_ref, mask_ref,                       # per-row-tile inputs
    w1_ref, b1_ref, w2_ref, b2_ref,        # linear_1 / linear_2 (LN affine folded in)
    w_gates_ref, b_gates_ref,              # fused [D,3D] gate W (r|z|g) + bias
    u_rz_ref,                              # fused [D,2D] gate U (r|z)
    ug_ref,                                # gate U_g (consumes r*residual)
    o_ref,                                 # output tile
    *, compute_dtype, act_dtype,
):
    x = x_ref[...].astype(jnp.float32)                     # [TM, D]
    d = x.shape[-1]

    # --- LayerNorm over feature dim (affine folded into w1/b1 offline) ---
    mu = jnp.mean(x, axis=-1, keepdims=True)
    xc = x - mu
    var = jnp.mean(xc * xc, axis=-1, keepdims=True)
    xn = xc * jax.lax.rsqrt(var + 1e-5)

    # --- linear_1 (D -> H) + GELU; MXU bf16, f32 accumulation ---
    h1 = jnp.dot(xn.astype(compute_dtype), w1_ref[...],
                 preferred_element_type=jnp.float32) + b1_ref[...]
    h1 = jax.nn.gelu(h1.astype(act_dtype), approximate=True)

    # --- linear_2 (H -> D) + GELU ---
    h2 = jnp.dot(h1.astype(compute_dtype), w2_ref[...],
                 preferred_element_type=jnp.float32) + b2_ref[...]
    h2 = jax.nn.gelu(h2.astype(act_dtype), approximate=True)

    # --- GRU gate: gru(vectors=h2, residual=x), fused gate matmuls ---
    res = x                                                # identity residual
    wx = jnp.dot(h2.astype(compute_dtype), w_gates_ref[...],
                 preferred_element_type=jnp.float32) + b_gates_ref[...]  # [TM,3D]
    ux = jnp.dot(res.astype(compute_dtype), u_rz_ref[...],
                 preferred_element_type=jnp.float32)                     # [TM,2D]

    # r and z first so the wx/ux slices die before the U_g matmul.
    r = jax.nn.sigmoid((wx[:, 0:d] + ux[:, 0:d]).astype(act_dtype))
    # gate_bias already folded into the z slice of b_gates (bz - gate_bias).
    z = jax.nn.sigmoid(
        (wx[:, d:2 * d] + ux[:, d:2 * d]).astype(act_dtype)
    ).astype(jnp.float32)
    wg_x = wx[:, 2 * d:3 * d]

    rres = r.astype(jnp.float32) * res
    h = jnp.tanh(
        (wg_x + jnp.dot(rres.astype(compute_dtype), ug_ref[...],
                        preferred_element_type=jnp.float32)).astype(act_dtype)
    ).astype(jnp.float32)

    out = (1.0 - z) * res + z * h

    # --- multiplicative sequence masking ---
    out = out * mask_ref[...]

    o_ref[...] = out.astype(o_ref.dtype)


# ---------------------------------------------------------------------------
# Hardware helpers
# ---------------------------------------------------------------------------
def _tpu_vmem_limit_bytes():
    """Generation-dependent VMEM limit (leave headroom for Mosaic scratch)."""
    cap = 128 * 1024 * 1024
    try:
        cap = int(pltpu.get_tpu_info().vmem_capacity_bytes)
    except Exception:
        pass
    # v7x (64 MiB physical) -> 48 MiB; v5e/v6e (128 MiB) -> 112 MiB.
    return int(max(32 * 1024 * 1024,
                   min(cap - 16 * 1024 * 1024, 112 * 1024 * 1024)))


def _default_act_dtype():
    """bf16 nonlinearities on v6e/v7x (bf16 VPU/EUP); f32 on v5e and older."""
    try:
        kind = jax.devices()[0].device_kind.lower()
    except Exception:
        return jnp.float32
    if any(f"v{n}" in kind for n in (2, 3, 4, 5)):
        return jnp.float32
    return jnp.bfloat16


def _invariant_spec(shape):
    """Whole-array, grid-invariant BlockSpec; single-buffered if supported."""
    try:
        return pl.BlockSpec(shape, lambda i: (0, 0),
                            pipeline_mode=pl.Buffered(1))
    except TypeError:  # older BlockSpec signature without pipeline_mode
        return pl.BlockSpec(shape, lambda i: (0, 0))


# ---------------------------------------------------------------------------
# Wrapper
# ---------------------------------------------------------------------------
def gru_block_forward(x, sequence_mask, params, *, row_tile=256,
                      compute_dtype=jnp.bfloat16, act_dtype=None,
                      min_grid_steps=8):
    """x: [T, B, D] float32; sequence_mask: [T, B, 1] float32 (0/1)."""
    T, B, D = x.shape
    N = T * B

    if act_dtype is None:
        act_dtype = _default_act_dtype()

    # Row tile: start from the requested tile (sweepable; larger is better on
    # v5e/v6e), but shrink so the 1-D "parallel" grid has at least
    # `min_grid_steps` steps (>= 4 per v7x TensorCore) for real pipelining.
    tm = int(row_tile)
    assert tm % 8 == 0, "row tile must be a multiple of 8 sublanes"
    while tm > 64 and pl.cdiv(N, tm) < min_grid_steps:
        tm //= 2
    tm = max(8, (tm // 8) * 8)

    x2 = x.reshape(N, D)
    m2 = sequence_mask.reshape(N, 1).astype(x.dtype)

    # Pad rows to a multiple of the tile (padded rows get mask 0, sliced off).
    pad = (-N) % tm
    if pad:
        x2 = jnp.pad(x2, ((0, pad), (0, 0)))
        m2 = jnp.pad(m2, ((0, pad), (0, 0)))
    n_total = N + pad

    row_spec = pl.BlockSpec((tm, D), lambda i: (i, 0))
    mask_spec = pl.BlockSpec((tm, 1), lambda i: (i, 0))

    weight_args = (
        params["w1"], params["b1"], params["w2"], params["b2"],
        params["w_gates"], params["b_gates"], params["u_rz"], params["ug"],
    )
    weight_specs = [_invariant_spec(a.shape) for a in weight_args]

    kernel = functools.partial(gru_block_kernel,
                               compute_dtype=compute_dtype,
                               act_dtype=act_dtype)

    out = pl.pallas_call(
        kernel,
        out_shape=jax.ShapeDtypeStruct((n_total, D), x.dtype),
        grid_spec=pltpu.PrefetchScalarGridSpec(
            num_scalar_prefetch=0,
            grid=(n_total // tm,),
            in_specs=[row_spec, mask_spec] + weight_specs,
            out_specs=row_spec,
        ),
        compiler_params=pltpu.CompilerParams(
            dimension_semantics=("parallel",),
            vmem_limit_bytes=_tpu_vmem_limit_bytes(),
        ),
    )(x2, m2, *weight_args)

    return out[:N].reshape(T, B, D)


# ---------------------------------------------------------------------------
# Parameters
# ---------------------------------------------------------------------------
def init_params(key, input_dim, hidden_dim, *, gate_initialization=2.0,
                weight_dtype=jnp.bfloat16):
    """Weights stored [in, out] (x @ W == PyTorch x @ weight.T).

    Offline folds (all done in f32, then cast):
      * LayerNorm affine into linear_1:  w1' = diag(gamma) @ w1,
        b1' = b1 + beta @ w1 (valid: the normalized activation feeds only
        linear_1 in this module).
      * Gate weights fused: w_gates = [wr | wz | wg] (D,3D),
        u_rz = [ur | uz] (D,2D); gate_bias folded into the z bias.
    """
    D, H = input_dim, hidden_dim
    keys = jax.random.split(key, 15)
    rnd = lambda k, shape, scale=0.05: jax.random.normal(k, shape, jnp.float32) * scale

    # LayerNorm affine (non-trivial, then folded away).
    gamma = 1.0 + rnd(keys[0], (1, D), 0.02)
    beta = rnd(keys[1], (1, D), 0.02)

    w1 = rnd(keys[2], (D, H)); b1 = rnd(keys[3], (1, H))
    w2 = rnd(keys[4], (H, D)); b2 = rnd(keys[5], (1, D))

    w1_folded = gamma.reshape(D, 1) * w1          # diag(gamma) @ w1
    b1_folded = b1 + beta @ w1                    # beta @ w1 + b1

    wr, wz, wg = rnd(keys[6], (D, D)), rnd(keys[7], (D, D)), rnd(keys[8], (D, D))
    ur, uz, ug = rnd(keys[9], (D, D)), rnd(keys[10], (D, D)), rnd(keys[11], (D, D))
    br, bz, bg = rnd(keys[12], (1, D)), rnd(keys[13], (1, D)), rnd(keys[14], (1, D))
    gate_bias = jnp.full((1, D), gate_initialization, jnp.float32)

    return {
        "w1": w1_folded.astype(weight_dtype),
        "b1": b1_folded,
        "w2": w2.astype(weight_dtype),
        "b2": b2,
        "w_gates": jnp.concatenate([wr, wz, wg], axis=1).astype(weight_dtype),
        "b_gates": jnp.concatenate([br, bz - gate_bias, bg], axis=1),
        "u_rz": jnp.concatenate([ur, uz], axis=1).astype(weight_dtype),
        "ug": ug.astype(weight_dtype),
    }


# ---------------------------------------------------------------------------
# Pure-JAX reference (same math, f32; GELU uses the tanh approximation)
# ---------------------------------------------------------------------------
def gru_block_reference(x, sequence_mask, params):
    T, B, D = x.shape
    f32 = lambda a: a.astype(jnp.float32)
    x2 = x.reshape(-1, D).astype(jnp.float32)
    mu = x2.mean(-1, keepdims=True)
    xc = x2 - mu
    var = (xc * xc).mean(-1, keepdims=True)
    xn = xc * jax.lax.rsqrt(var + 1e-5)
    h1 = jax.nn.gelu(xn @ f32(params["w1"]) + params["b1"], approximate=True)
    h2 = jax.nn.gelu(h1 @ f32(params["w2"]) + params["b2"], approximate=True)
    wx = h2 @ f32(params["w_gates"]) + params["b_gates"]
    ux = x2 @ f32(params["u_rz"])
    r = jax.nn.sigmoid(wx[:, :D] + ux[:, :D])
    z = jax.nn.sigmoid(wx[:, D:2 * D] + ux[:, D:2 * D])
    h = jnp.tanh(wx[:, 2 * D:] + (r * x2) @ f32(params["ug"]))
    out = (1.0 - z) * x2 + z * h
    out = out * sequence_mask.reshape(-1, 1)
    return out.reshape(T, B, D)


# ---------------------------------------------------------------------------
# Demo
# ---------------------------------------------------------------------------
if __name__ == "__main__":
    # Lane-dense demo: D multiple of 128, N = T*B = 1024 rows so the auto
    # tile (128) gives an 8-step "parallel" grid (>= 4 steps per v7x TC).
    T, B, D = 32, 32, 128
    H = 2 * D  # transformer_dim_scale = 2.0

    key = jax.random.PRNGKey(0)
    k_x, k_m, k_p = jax.random.split(key, 3)

    x = jax.random.normal(k_x, (T, B, D), jnp.float32)
    sequence_mask = (
        jax.random.uniform(k_m, (T, B, 1)) > 0.2
    ).astype(jnp.float32)

    params = init_params(k_p, D, H)

    fwd = jax.jit(functools.partial(gru_block_forward, row_tile=256))
    y = fwd(x, sequence_mask, params)
    jax.block_until_ready(y)

    assert y.shape == (T, B, D)
    assert jnp.all(jnp.isfinite(y))

    # Tolerance check vs f32 reference (bf16 MXU operands / activations).
    y_ref = gru_block_reference(x, sequence_mask, params)
    max_err = float(jnp.max(jnp.abs(y - y_ref)))
    assert max_err < 0.1, f"max abs error {max_err} too large"

    print("KERNEL_OK")
</pallas_src>

<mosaic_0001>
module attributes {stable_mosaic.version = 11 : i64} {
  func.func @gru_block_kernel(%arg0: i32, %arg1: memref<128x128xf32, #tpu.memory_space<vmem>>, %arg2: memref<128x1xf32, #tpu.memory_space<vmem>>, %arg3: memref<128x256xbf16, #tpu.memory_space<vmem>>, %arg4: memref<1x256xf32, #tpu.memory_space<vmem>>, %arg5: memref<256x128xbf16, #tpu.memory_space<vmem>>, %arg6: memref<1x128xf32, #tpu.memory_space<vmem>>, %arg7: memref<128x384xbf16, #tpu.memory_space<vmem>>, %arg8: memref<1x384xf32, #tpu.memory_space<vmem>>, %arg9: memref<128x256xbf16, #tpu.memory_space<vmem>>, %arg10: memref<128x128xbf16, #tpu.memory_space<vmem>>, %arg11: memref<128x128xf32, #tpu.memory_space<vmem>>) attributes {dimension_semantics = [#tpu.dimension_semantics<parallel>], iteration_bounds = array<i64: 8>, scalar_prefetch = 0 : i64, scratch_operands = 0 : i64, tpu.core_type = #tpu.core_type<tc>, window_params = [{transform_indices = @transform_0, window_bounds = array<i64: 128, 128>}, {transform_indices = @transform_1, window_bounds = array<i64: 128, 1>}, {pipeline_mode = #tpu.pipeline_mode<synchronous>, transform_indices = @transform_2, window_bounds = array<i64: 128, 256>}, {pipeline_mode = #tpu.pipeline_mode<synchronous>, transform_indices = @transform_3, window_bounds = array<i64: 1, 256>}, {pipeline_mode = #tpu.pipeline_mode<synchronous>, transform_indices = @transform_4, window_bounds = array<i64: 256, 128>}, {pipeline_mode = #tpu.pipeline_mode<synchronous>, transform_indices = @transform_5, window_bounds = array<i64: 1, 128>}, {pipeline_mode = #tpu.pipeline_mode<synchronous>, transform_indices = @transform_6, window_bounds = array<i64: 128, 384>}, {pipeline_mode = #tpu.pipeline_mode<synchronous>, transform_indices = @transform_7, window_bounds = array<i64: 1, 384>}, {pipeline_mode = #tpu.pipeline_mode<synchronous>, transform_indices = @transform_8, window_bounds = array<i64: 128, 256>}, {pipeline_mode = #tpu.pipeline_mode<synchronous>, transform_indices = @transform_9, window_bounds = array<i64: 128, 128>}, {transform_indices = @transform_10, window_bounds = array<i64: 128, 128>}]} {
    %c0 = arith.constant 0 : index
    %c0_0 = arith.constant 0 : index
    %0 = vector.load %arg1[%c0, %c0_0] : memref<128x128xf32, #tpu.memory_space<vmem>>, vector<128x128xf32>
    %cst = arith.constant dense<0.000000e+00> : vector<128xf32>
    %1 = vector.multi_reduction <add>, %0, %cst [1] : vector<128x128xf32> to vector<128xf32>
    %2 = vector.shape_cast %1 : vector<128xf32> to vector<128x1xf32>
    %cst_1 = arith.constant 1.280000e+02 : f32
    %3 = vector.broadcast %cst_1 : f32 to vector<128x1xf32>
    %4 = arith.divf %2, %3 : vector<128x1xf32>
    %5 = vector.broadcast %4 : vector<128x1xf32> to vector<128x128xf32>
    %6 = arith.subf %0, %5 : vector<128x128xf32>
    %7 = arith.mulf %6, %6 : vector<128x128xf32>
    %cst_2 = arith.constant dense<0.000000e+00> : vector<128xf32>
    %8 = vector.multi_reduction <add>, %7, %cst_2 [1] : vector<128x128xf32> to vector<128xf32>
    %9 = vector.shape_cast %8 : vector<128xf32> to vector<128x1xf32>
    %cst_3 = arith.constant 1.280000e+02 : f32
    %10 = vector.broadcast %cst_3 : f32 to vector<128x1xf32>
    %11 = arith.divf %9, %10 : vector<128x1xf32>
    %cst_4 = arith.constant 9.99999974E-6 : f32
    %12 = vector.broadcast %cst_4 : f32 to vector<128x1xf32>
    %13 = arith.addf %11, %12 : vector<128x1xf32>
    %14 = math.rsqrt %13 : vector<128x1xf32>
    %15 = vector.broadcast %14 : vector<128x1xf32> to vector<128x128xf32>
    %16 = arith.mulf %6, %15 : vector<128x128xf32>
    %17 = arith.truncf %16 : vector<128x128xf32> to vector<128x128xbf16>
    %c0_5 = arith.constant 0 : index
    %c0_6 = arith.constant 0 : index
    %18 = vector.load %arg3[%c0_5, %c0_6] : memref<128x256xbf16, #tpu.memory_space<vmem>>, vector<128x256xbf16>
    %cst_7 = arith.constant dense<0.000000e+00> : vector<128x256xf32>
    %19 = tpu.matmul %17, %18, %cst_7 {dimension_numbers = #tpu.dot_dimension_numbers<[1], [0], [0], [1], [0, 0, 1, 1], [], []>} : vector<128x128xbf16>, vector<128x256xbf16>, vector<128x256xf32> -> vector<128x256xf32>
    %c0_8 = arith.constant 0 : index
    %c0_9 = arith.constant 0 : index
    %20 = vector.load %arg4[%c0_8, %c0_9] : memref<1x256xf32, #tpu.memory_space<vmem>>, vector<1x256xf32>
    %21 = vector.broadcast %20 : vector<1x256xf32> to vector<128x256xf32>
    %22 = arith.addf %19, %21 : vector<128x256xf32>
    %23 = arith.truncf %22 : vector<128x256xf32> to vector<128x256xbf16>
    %24 = arith.mulf %23, %23 : vector<128x256xbf16>
    %25 = arith.mulf %23, %24 : vector<128x256xbf16>
    %cst_10 = arith.constant 4.467770e-02 : bf16
    %26 = vector.broadcast %cst_10 : bf16 to vector<128x256xbf16>
    %27 = arith.mulf %26, %25 : vector<128x256xbf16>
    %28 = arith.addf %23, %27 : vector<128x256xbf16>
    %cst_11 = arith.constant 7.968750e-01 : bf16
    %29 = vector.broadcast %cst_11 : bf16 to vector<128x256xbf16>
    %30 = arith.mulf %29, %28 : vector<128x256xbf16>
    %31 = math.tanh %30 : vector<128x256xbf16>
    %cst_12 = arith.constant 1.000000e+00 : bf16
    %32 = vector.broadcast %cst_12 : bf16 to vector<128x256xbf16>
    %33 = arith.addf %32, %31 : vector<128x256xbf16>
    %cst_13 = arith.constant 5.000000e-01 : bf16
    %34 = vector.broadcast %cst_13 : bf16 to vector<128x256xbf16>
    %35 = arith.mulf %34, %33 : vector<128x256xbf16>
    %36 = arith.mulf %23, %35 : vector<128x256xbf16>
    %c0_14 = arith.constant 0 : index
    %c0_15 = arith.constant 0 : index
    %37 = vector.load %arg5[%c0_14, %c0_15] : memref<256x128xbf16, #tpu.memory_space<vmem>>, vector<256x128xbf16>
    %cst_16 = arith.constant dense<0.000000e+00> : vector<128x128xf32>
    %38 = tpu.matmul %36, %37, %cst_16 {dimension_numbers = #tpu.dot_dimension_numbers<[1], [0], [0], [1], [0, 0, 1, 1], [], []>} : vector<128x256xbf16>, vector<256x128xbf16>, vector<128x128xf32> -> vector<128x128xf32>
    %c0_17 = arith.constant 0 : index
    %c0_18 = arith.constant 0 : index
    %39 = vector.load %arg6[%c0_17, %c0_18] : memref<1x128xf32, #tpu.memory_space<vmem>>, vector<1x128xf32>
    %40 = vector.broadcast %39 : vector<1x128xf32> to vector<128x128xf32>
    %41 = arith.addf %38, %40 : vector<128x128xf32>
    %42 = arith.truncf %41 : vector<128x128xf32> to vector<128x128xbf16>
    %43 = arith.mulf %42, %42 : vector<128x128xbf16>
    %44 = arith.mulf %42, %43 : vector<128x128xbf16>
    %cst_19 = arith.constant 4.467770e-02 : bf16
    %45 = vector.broadcast %cst_19 : bf16 to vector<128x128xbf16>
    %46 = arith.mulf %45, %44 : vector<128x128xbf16>
    %47 = arith.addf %42, %46 : vector<128x128xbf16>
    %cst_20 = arith.constant 7.968750e-01 : bf16
    %48 = vector.broadcast %cst_20 : bf16 to vector<128x128xbf16>
    %49 = arith.mulf %48, %47 : vector<128x128xbf16>
    %50 = math.tanh %49 : vector<128x128xbf16>
    %cst_21 = arith.constant 1.000000e+00 : bf16
    %51 = vector.broadcast %cst_21 : bf16 to vector<128x128xbf16>
    %52 = arith.addf %51, %50 : vector<128x128xbf16>
    %cst_22 = arith.constant 5.000000e-01 : bf16
    %53 = vector.broadcast %cst_22 : bf16 to vector<128x128xbf16>
    %54 = arith.mulf %53, %52 : vector<128x128xbf16>
    %55 = arith.mulf %42, %54 : vector<128x128xbf16>
    %c0_23 = arith.constant 0 : index
    %c0_24 = arith.constant 0 : index
    %56 = vector.load %arg7[%c0_23, %c0_24] : memref<128x384xbf16, #tpu.memory_space<vmem>>, vector<128x384xbf16>
    %cst_25 = arith.constant dense<0.000000e+00> : vector<128x384xf32>
    %57 = tpu.matmul %55, %56, %cst_25 {dimension_numbers = #tpu.dot_dimension_numbers<[1], [0], [0], [1], [0, 0, 1, 1], [], []>} : vector<128x128xbf16>, vector<128x384xbf16>, vector<128x384xf32> -> vector<128x384xf32>
    %c0_26 = arith.constant 0 : index
    %c0_27 = arith.constant 0 : index
    %58 = vector.load %arg8[%c0_26, %c0_27] : memref<1x384xf32, #tpu.memory_space<vmem>>, vector<1x384xf32>
    %59 = vector.broadcast %58 : vector<1x384xf32> to vector<128x384xf32>
    %60 = arith.addf %57, %59 : vector<128x384xf32>
    %61 = arith.truncf %0 : vector<128x128xf32> to vector<128x128xbf16>
    %c0_28 = arith.constant 0 : index
    %c0_29 = arith.constant 0 : index
    %62 = vector.load %arg9[%c0_28, %c0_29] : memref<128x256xbf16, #tpu.memory_space<vmem>>, vector<128x256xbf16>
    %cst_30 = arith.constant dense<0.000000e+00> : vector<128x256xf32>
    %63 = tpu.matmul %61, %62, %cst_30 {dimension_numbers = #tpu.dot_dimension_numbers<[1], [0], [0], [1], [0, 0, 1, 1], [], []>} : vector<128x128xbf16>, vector<128x256xbf16>, vector<128x256xf32> -> vector<128x256xf32>
    %64 = vector.extract_strided_slice %60 {offsets = [0, 0], sizes = [128, 128], strides = [1, 1]} : vector<128x384xf32> to vector<128x128xf32>
    %65 = vector.extract_strided_slice %63 {offsets = [0, 0], sizes = [128, 128], strides = [1, 1]} : vector<128x256xf32> to vector<128x128xf32>
    %66 = arith.addf %64, %65 : vector<128x128xf32>
    %67 = arith.truncf %66 : vector<128x128xf32> to vector<128x128xbf16>
    %68 = arith.negf %67 : vector<128x128xbf16>
    %69 = math.exp %68 : vector<128x128xbf16>
    %cst_31 = arith.constant 1.000000e+00 : bf16
    %70 = vector.broadcast %cst_31 : bf16 to vector<128x128xbf16>
    %71 = arith.addf %70, %69 : vector<128x128xbf16>
    %72 = arith.divf %70, %71 : vector<128x128xbf16>
    %73 = vector.extract_strided_slice %60 {offsets = [0, 128], sizes = [128, 128], strides = [1, 1]} : vector<128x384xf32> to vector<128x128xf32>
    %74 = vector.extract_strided_slice %63 {offsets = [0, 128], sizes = [128, 128], strides = [1, 1]} : vector<128x256xf32> to vector<128x128xf32>
    %75 = arith.addf %73, %74 : vector<128x128xf32>
    %76 = arith.truncf %75 : vector<128x128xf32> to vector<128x128xbf16>
    %77 = arith.negf %76 : vector<128x128xbf16>
    %78 = math.exp %77 : vector<128x128xbf16>
    %cst_32 = arith.constant 1.000000e+00 : bf16
    %79 = vector.broadcast %cst_32 : bf16 to vector<128x128xbf16>
    %80 = arith.addf %79, %78 : vector<128x128xbf16>
    %81 = arith.divf %79, %80 : vector<128x128xbf16>
    %82 = arith.extf %81 : vector<128x128xbf16> to vector<128x128xf32>
    %83 = vector.extract_strided_slice %60 {offsets = [0, 256], sizes = [128, 128], strides = [1, 1]} : vector<128x384xf32> to vector<128x128xf32>
    %84 = arith.extf %72 : vector<128x128xbf16> to vector<128x128xf32>
    %85 = arith.mulf %84, %0 : vector<128x128xf32>
    %86 = arith.truncf %85 : vector<128x128xf32> to vector<128x128xbf16>
    %c0_33 = arith.constant 0 : index
    %c0_34 = arith.constant 0 : index
    %87 = vector.load %arg10[%c0_33, %c0_34] : memref<128x128xbf16, #tpu.memory_space<vmem>>, vector<128x128xbf16>
    %cst_35 = arith.constant dense<0.000000e+00> : vector<128x128xf32>
    %88 = tpu.matmul %86, %87, %cst_35 {dimension_numbers = #tpu.dot_dimension_numbers<[1], [0], [0], [1], [0, 0, 1, 1], [], []>} : vector<128x128xbf16>, vector<128x128xbf16>, vector<128x128xf32> -> vector<128x128xf32>
    %89 = arith.addf %83, %88 : vector<128x128xf32>
    %90 = arith.truncf %89 : vector<128x128xf32> to vector<128x128xbf16>
    %91 = math.tanh %90 : vector<128x128xbf16>
    %92 = arith.extf %91 : vector<128x128xbf16> to vector<128x128xf32>
    %cst_36 = arith.constant 1.000000e+00 : f32
    %93 = vector.broadcast %cst_36 : f32 to vector<128x128xf32>
    %94 = arith.subf %93, %82 : vector<128x128xf32>
    %95 = arith.mulf %94, %0 : vector<128x128xf32>
    %96 = arith.mulf %82, %92 : vector<128x128xf32>
    %97 = arith.addf %95, %96 : vector<128x128xf32>
    %c0_37 = arith.constant 0 : index
    %c0_38 = arith.constant 0 : index
    %98 = vector.load %arg2[%c0_37, %c0_38] : memref<128x1xf32, #tpu.memory_space<vmem>>, vector<128x1xf32>
    %99 = vector.broadcast %98 : vector<128x1xf32> to vector<128x128xf32>
    %100 = arith.mulf %97, %99 : vector<128x128xf32>
    %c0_39 = arith.constant 0 : index
    %c0_40 = arith.constant 0 : index
    %101 = vector.load %arg11[%c0_39, %c0_40] : memref<128x128xf32, #tpu.memory_space<vmem>>, vector<128x128xf32>
    tpu.vector_store %arg11[%c0_39, %c0_40], %100 {strides = array<i32>} : memref<128x128xf32, #tpu.memory_space<vmem>>, vector<128x128xf32>,
    return
  }
  func.func @transform_0(%arg0: i32) -> (i32, i32) {
    %c0_i32 = arith.constant 0 : i32
    %c0_i32_0 = arith.constant 0 : i32
    return %arg0, %c0_i32 : i32, i32
  }
  func.func @transform_1(%arg0: i32) -> (i32, i32) {
    %c0_i32 = arith.constant 0 : i32
    %c0_i32_0 = arith.constant 0 : i32
    return %arg0, %c0_i32 : i32, i32
  }
  func.func @transform_2(%arg0: i32) -> (i32, i32) {
    %c0_i32 = arith.constant 0 : i32
    %c0_i32_0 = arith.constant 0 : i32
    %c0_i32_1 = arith.constant 0 : i32
    return %c0_i32, %c0_i32_0 : i32, i32
  }
  func.func @transform_3(%arg0: i32) -> (i32, i32) {
    %c0_i32 = arith.constant 0 : i32
    %c0_i32_0 = arith.constant 0 : i32
    %c0_i32_1 = arith.constant 0 : i32
    return %c0_i32, %c0_i32_0 : i32, i32
  }
  func.func @transform_4(%arg0: i32) -> (i32, i32) {
    %c0_i32 = arith.constant 0 : i32
    %c0_i32_0 = arith.constant 0 : i32
    %c0_i32_1 = arith.constant 0 : i32
    return %c0_i32, %c0_i32_0 : i32, i32
  }
  func.func @transform_5(%arg0: i32) -> (i32, i32) {
    %c0_i32 = arith.constant 0 : i32
    %c0_i32_0 = arith.constant 0 : i32
    %c0_i32_1 = arith.constant 0 : i32
    return %c0_i32, %c0_i32_0 : i32, i32
  }
  func.func @transform_6(%arg0: i32) -> (i32, i32) {
    %c0_i32 = arith.constant 0 : i32
    %c0_i32_0 = arith.constant 0 : i32
    %c0_i32_1 = arith.constant 0 : i32
    return %c0_i32, %c0_i32_0 : i32, i32
  }
  func.func @transform_7(%arg0: i32) -> (i32, i32) {
    %c0_i32 = arith.constant 0 : i32
    %c0_i32_0 = arith.constant 0 : i32
    %c0_i32_1 = arith.constant 0 : i32
    return %c0_i32, %c0_i32_0 : i32, i32
  }
  func.func @transform_8(%arg0: i32) -> (i32, i32) {
    %c0_i32 = arith.constant 0 : i32
    %c0_i32_0 = arith.constant 0 : i32
    %c0_i32_1 = arith.constant 0 : i32
    return %c0_i32, %c0_i32_0 : i32, i32
  }
  func.func @transform_9(%arg0: i32) -> (i32, i32) {
    %c0_i32 = arith.constant 0 : i32
    %c0_i32_0 = arith.constant 0 : i32
    %c0_i32_1 = arith.constant 0 : i32
    return %c0_i32, %c0_i32_0 : i32, i32
  }
  func.func @transform_10(%arg0: i32) -> (i32, i32) {
    %c0_i32 = arith.constant 0 : i32
    %c0_i32_0 = arith.constant 0 : i32
    return %arg0, %c0_i32 : i32, i32
  }
}

</mosaic_0001>

<bundles_post_ra>
// kernel: gru_block_forward.1
= control target key start
LH: loop header
LB: loop body
LE: loop exit
PB: predicated region body
PF: predicated region fallthrough
CT: control target
= control target key end

     0   :  { %s4551_s0 = inlined_call_operand.vmem [shape: f32[1024,128], index: 0, kind: input, shape index: {}]   ;;  %s4552_s1 = inlined_call_operand.vmem [shape: f32[1024,1], index: 1, kind: input, shape index: {}]   ;;  %s4553_s2 = inlined_call_operand.hbm [shape: bf16[128,256], index: 2, kind: input, shape index: {}]   ;;  %s4554_s3 = inlined_call_operand.vmem [shape: f32[1,256], index: 3, kind: input, shape index: {}]   ;;  %s4555_s4 = inlined_call_operand.hbm [shape: bf16[256,128], index: 4, kind: input, shape index: {}]   ;;  %s4556_s5 = inlined_call_operand.vmem [shape: f32[1,128], index: 5, kind: input, shape index: {}]   ;;  %s4557_s6 = inlined_call_operand.hbm [shape: bf16[128,384], index: 6, kind: input, shape index: {}]   ;;  %s4558_s7 = inlined_call_operand.vmem [shape: f32[1,384], index: 7, kind: input, shape index: {}]   ;;  %s4559_s8 = inlined_call_operand.hbm [shape: bf16[128,256], index: 8, kind: input, shape index: {}]   ;;  %s4560_s9 = inlined_call_operand.vmem [shape: bf16[128,128], index: 9, kind: input, shape index: {}]   ;;  %s4561_s10 = inlined_call_operand.hbm [shape: f32[1024,128], index: 10, kind: output, shape index: {}]  }
   0x1   :  { %4565 = sst [smem:[#allocation24_spill]] %s4555_s4 }
   0x2   :  { %15 = vsyncpa [#allocation3], 0 }
   0x3   :  { %16 = vsyncpa [#allocation6], 0 }
   0x4   :  { %17 = vsyncpa [#allocation9], 0 }
   0x5   :  { %18 = vsyncpa [#allocation4], 0 }
   0x6   :  { %20 = vsyncpa [#allocation4 + $0x1], 0  ;;  %s3597_s13 = smov 0   ;;  %s3599_s14 = smov 0  }
   0x7   :  { %s3601_s15 = smov 0   ;;  %s3603_s16 = smov 0  }
   0x8 LB: > { %s3618_s17 = sadd.s32 4294967295, %s3526_s16   ;;  %s2691_s18 = sadd.s32 4294967294, %s3526_s16   ;;  %s3526_s16 = sphi %s3603_s16, %s4607_s16   ;;  %s3522_s15 = sphi %s3601_s15, %s4606_s15   ;;  %s3518_s14 = sphi %s3599_s14, %s4605_s14   ;;  %s3514_s13 = sphi %s3597_s13, %s4604_s13  }
   0x9   : > { %s3622_s19 = sadd.s32 1, %s3526_s16   ;;  %s253_s20 = sadd.s32 1, %s3522_s15 }
   0xa   : > { %s250_s21 = ssub.s32 %s3526_s16, %s3622_s19  ;;  %p263_p0 = scmp.ne.s32.totalorder %s3522_s15, %s3518_s14 }
   0xb   : > { %p251_p1 = scmp.eq.s32.totalorder %s250_s21, 0  ;;  %p264_p2 = scmp.eq.s32.totalorder %s3618_s17, 7 }
   0xc   : > { %p269_p3 = scmp.ne.s32.totalorder %s3518_s14, %s3514_s13  ;;  %p270_p4 = scmp.eq.s32.totalorder %s2691_s18, 7 }
   0xd   : > { %s3633_s22 = scalar_select %p251_p1, %s3522_s15, %s253_s20  }
   0xe   : > { %p3635_p5 = por %p264_p2, %p263_p0  ;;  %p3639_p6 = por %p270_p4, %p269_p3 }
   0xf   : > { %p2692_p7 = scmp.ge.s32.totalorder %s3526_s16, 1  ;;  %p277_p8 = scmp.lt.s32.totalorder %s3526_s16, 9 }
  0x10   : > { %s4567_s24 = scalar_select %p3639_p6, 1, 0 }
  0x11   : > { %p4562_p9 = scmp.eq.s32.totalorder %s3618_s17, 0  ;;  %p3646_p10 = pnand %p2692_p7, %p277_p8 }
  0x12   : > { %s3528_s26 = smov [#allocation5]   ;;  %s3529_s29 = smov [#allocation2]  }
  0x13   : > { %s305_s27 = sshll.u32 %s3528_s26, 4  ;;  %p2989_p11 = pneg %p3646_p10  ;;  %s306_s27 = int_to_ptr.vmem [resolvable:$true] %s305_s27 }
  0x14   : > { %s289_s30 = sshll.u32 %s3529_s29, 4  ;;  %s3361_s11 = scalar_lea.vmem %s306_s27, 2048  ;;  %s290_s30 = int_to_ptr.vmem [resolvable:$true] %s289_s30 }
  0x15   : > { %p3654_p12 = pnand %p4562_p9, %p2989_p11  ;;  %p3362_p0 = scmp.ne.s32.totalorder %s306_s27, %s3361_s11 }
  0x16   : > { %p3369_p3 = scmp.lt.s32.totalorder %s306_s27, %s306_s27  ;;  %p3370_p4 = scmp.lt.s32.totalorder %s3361_s11, %s3361_s11 }
  0x17   : > { %p3352_p13 = pneg %p3654_p12 }
  0x18   : > { %p3371_p7 = por %p3370_p4, %p3369_p3 }
  0x19   : > { %p3364_p1 = pnand %p3362_p0, %p3352_p13 }
  0x1b   : > { %p3365_p2 = pneg %p3364_p1 }
  0x1d   : > { %p3372_p8 = pnand %p3371_p7, %p3365_p2 }
  0x1f   : > { %3375 = shalt.err (!%p3372_p8)
}
  0x20   : > { %s3530_s12 = smov 64   ;;  %s3531_s18 = smov 4  }
  0x21   : > { %s4570_s4 = sld [smem:[#allocation24_spill]]  ;;  %s3387_s26 = scalar_lea.vmem %s290_s30, 2048 }
  0x22   : > { %p3388_p11 = scmp.ne.s32.totalorder %s290_s30, %s3387_s26  ;;  %p3395_p9 = scmp.lt.s32.totalorder %s290_s30, %s290_s30 }
  0x23   : > { %p3396_p6 = scmp.lt.s32.totalorder %s3387_s26, %s3387_s26 }
  0x24   : > { %p3390_p0 = pnand %p3388_p11, %p3352_p13 }
  0x25   : > { %p3397_p3 = por %p3396_p6, %p3395_p9 }
  0x26   : > { %p3391_p1 = pneg %p3390_p0 }
  0x27   : > { %2995 = dma.hbm_to_vmem [thread:$0]  (!%p3654_p12), %s4570_s4, 2048, %s306_s27, [#allocation6], %s3530_s12, %s3530_s12, %s3531_s18  }
  0x28   : > { %p3398_p2 = pnand %p3397_p3, %p3391_p1 }
  0x2a   : > { %3401 = shalt.err (!%p3398_p2)
}
  0x2b   : > { %s4563_s29 = smov 128   ;;  %s3533_s11 = smov 8  }
  0x2c   : > { %2992 = dma.hbm_to_vmem [thread:$0]  (!%p3654_p12), %s4553_s2, 2048, %s290_s30, [#allocation3], %s4563_s29, %s4563_s29, %s3533_s11  }
  0x2d   : > { %s3534_s18 = smov [#allocation7]  }
  0x2e   : > { %s321_s20 = sshll.u32 %s3534_s18, 4  ;;  %s322_s20 = int_to_ptr.vmem [resolvable:$true] %s321_s20 }
  0x2f   : > { %s3413_s21 = scalar_lea.vmem %s322_s20, 3072  ;;  %p3421_p7 = scmp.lt.s32.totalorder %s322_s20, %s322_s20 }
  0x30   : > { %p3414_p4 = scmp.ne.s32.totalorder %s322_s20, %s3413_s21  ;;  %p3422_p8 = scmp.lt.s32.totalorder %s3413_s21, %s3413_s21 }
  0x32   : > { %p3416_p6 = pnand %p3414_p4, %p3352_p13  ;;  %p3423_p11 = por %p3422_p8, %p3421_p7 }
  0x34   : > { %p3417_p9 = pneg %p3416_p6 }
  0x36   : > { %p3424_p0 = pnand %p3423_p11, %p3417_p9 }
  0x38   : > { %3427 = shalt.err (!%p3424_p0)
}
  0x39   : > { %s3535_s26 = smov 192   ;;  %s3536_s4 = smov 12  }
  0x3a   : > { %2998 = dma.hbm_to_vmem [thread:$0]  (!%p3654_p12), %s4557_s6, 3072, %s322_s20, [#allocation6], %s3535_s26, %s3535_s26, %s3536_s4  }
  0x3b   : > { %s3537_s12 = smov [#allocation8]  }
  0x3c   : > { %s337_s18 = sshll.u32 %s3537_s12, 4  ;;  %s338_s18 = int_to_ptr.vmem [resolvable:$true] %s337_s18 }
  0x3d   : > { %s3439_s29 = scalar_lea.vmem %s338_s18, 2048  ;;  %p3447_p4 = scmp.lt.s32.totalorder %s338_s18, %s338_s18 }
  0x3e   : > { %p3440_p1 = scmp.ne.s32.totalorder %s338_s18, %s3439_s29  ;;  %p3448_p6 = scmp.lt.s32.totalorder %s3439_s29, %s3439_s29 }
  0x40   : > { %p3442_p3 = pnand %p3440_p1, %p3352_p13  ;;  %p3449_p9 = por %p3448_p6, %p3447_p4 }
  0x42   : > { %p3443_p2 = pneg %p3442_p3 }
  0x44   : > { %p3450_p7 = pnand %p3449_p9, %p3443_p2 }
  0x46   : > { %3453 = shalt.err (!%p3450_p7)
}
  0x47   : > { %s4571_s21 = smov 128   ;;  %374 = sbr.rel (%p3646_p10) target bundleno = 1475 (0x5c3), region = 60 }
  0x48   : > { %3001 = dma.hbm_to_vmem [thread:$0]  (!%p3654_p12), %s4559_s8, 2048, %s338_s18, [#allocation9], %s4571_s21, %s4571_s21, %s3533_s11  }
  0x4c   : > { %p4572_p13 = scmp.eq.s32.totalorder %s3618_s17, 0 }
  0x4e   : > { %3497 = dma.done.wait (%p4572_p13), [#allocation3], 2048   ;;  %p4573_p8 = pmov %p4572_p13 }
  0x50   : > { %3499 = vsyncadd (%p4573_p8), [#allocation3], 4294965248  ;;  %p4574_p11 = pmov %p4573_p8 }
  0x51   : > { %p4575_p0 = pmov %p4573_p8 }
  0x52   : > { %3501 = dma.done.wait (%p4574_p11), [#allocation6], 5120  }
  0x53   : > { %3503 = vsyncadd (%p4575_p0), [#allocation6], 4294962176  ;;  %p4576_p1 = pmov %p4575_p0 }
  0x54   : > { %p4577_p12 = pmov %p4575_p0 }
  0x55   : > { %3505 = dma.done.wait (%p4576_p1), [#allocation9], 2048  }
  0x56   : > { %3507 = vsyncadd (%p4577_p12), [#allocation9], 4294965248  ;;  %s2704_s25 = sshll.u32 %s3618_s17, 4  ;;  %v3062_v16 = vld [vmem:[#allocation2 + $0x74] ss:$8 sps:$4 sm:$0xff]   ;;  %s426_s4 = sand.u32 1, %s3518_s14  }
  0x57   : > { %p430_p10 = scmp.lt.s32.totalorder %s2704_s25, 127  ;;  %v3064_v17 = vld [vmem:[#allocation2 + $0x70] ss:$8 sps:$4 sm:$0xff]   ;;  %v3065_v18 = vld [vmem:[#allocation2 + $0x64] ss:$8 sps:$4 sm:$0xff]   ;;  %756 = vmatprep.subr.bf16.mxu0 %v3062_v16  ;;  %s2703_s20 = sshll.u32 %s426_s4, 7 }
  0x58   : > { %757 = vmatpush1.bf16.msra.mxu0 %v3064_v17  ;;  %v3067_v19 = vld [vmem:[#allocation2 + $0x60] ss:$8 sps:$4 sm:$0xff]   ;;  %v3068_v55 = vld [vmem:[#allocation2 + $0x54] ss:$8 sps:$4 sm:$0xff]   ;;  %v3070_v56 = vld [vmem:[#allocation2 + $0x50] ss:$8 sps:$4 sm:$0xff]  }
  0x59   : > { %s4609_s25 = smov (!%p430_p10, %s2704_s25), 127  ;;  %758 = vmatprep.subr.bf16.mxu0 %v3065_v18  ;;  %s4452_s29 = scalar_lea.vmem [#allocation10], %s2703_s20 }
  0x5a   : > { %s2705_s28 = sshll.u32 %s4609_s25, 3  ;;  %s2810_s11 = sshll.u32 %s3618_s17, 11 }
  0x5b   : > { %s3721_s26 = scalar_lea.vmem %s4551_s0, %s2705_s28  ;;  %s4221_s21 = scalar_lea.vmem %s4552_s1, %s2705_s28 }
  0x5c   : > { %v447_v0 = vld [vmem:[%s3721_s26] sm:$0xff]  ;;  %v449_v1 = vld [vmem:[%s3721_s26 + $0x10] sm:$0xff]  ;;  %v448_v2 = vld [vmem:[%s3721_s26 + $0x8] sm:$0xff]  ;;  %759 = vmatpush1.bf16.msra.mxu0 %v3067_v19  ;;  %s2576_s30 = sshll.u32 %s4452_s29, 4  ;;  %s4501_s12 = scalar_lea.hbm %s4561_s10, %s2810_s11  ;;  %s4503_s30 = int_to_ptr.vmem [resolvable:$true] %s2576_s30 }
  0x5d   : > { %463 = vadd.xlane.f32.xlu0 %v447_v0  ;;  %467 = vadd.xlane.f32.xlu1 %v449_v1  ;;  %v450_v3 = vld [vmem:[%s3721_s26 + $0x18] sm:$0xff]  ;;  %v451_v4 = vld [vmem:[%s3721_s26 + $0x20] sm:$0xff]  ;;  %v452_v5 = vld [vmem:[%s3721_s26 + $0x28] sm:$0xff]  ;;  %s4511_s17 = scalar_lea.sflag [#allocation4], %s426_s4  ;;  %s3454_s18 = scalar_lea.vmem %s4503_s30, 2048 }
  0x5e   : > { %v453_v6 = vld [vmem:[%s3721_s26 + $0x30] sm:$0xff]  ;;  %v454_v7 = vld [vmem:[%s3721_s26 + $0x38] sm:$0xff]  ;;  %v3732_v8 = vld [vmem:[%s3721_s26 + $0x40] sm:$0xff]  ;;  %760 = vmatprep.subr.bf16.mxu0 %v3068_v55  ;;  %p3455_p3 = scmp.ne.s32.totalorder %s4503_s30, %s3454_s18 }
  0x5f   : > { %v3735_v9 = vld [vmem:[%s3721_s26 + $0x48] sm:$0xff]  ;;  %v3738_v10 = vld [vmem:[%s3721_s26 + $0x50] sm:$0xff]  ;;  %v3741_v11 = vld [vmem:[%s3721_s26 + $0x58] sm:$0xff] }
  0x60   : > { %v3746_v12 = vld [vmem:[%s3721_s26 + $0x60] sm:$0xff]  ;;  %v3749_v13 = vld [vmem:[%s3721_s26 + $0x68] sm:$0xff]  ;;  %v3754_v14 = vld [vmem:[%s3721_s26 + $0x70] sm:$0xff]  ;;  %761 = vmatpush1.bf16.msra.mxu0 %v3070_v56  ;;  %p3456_p2 = pnand %p3455_p3, %p3635_p5 }
  0x61   : > { %465 = vadd.xlane.f32.xlu0 %v448_v2  ;;  %469 = vadd.xlane.f32.xlu1 %v450_v3  ;;  %v3757_v15 = vld [vmem:[%s3721_s26 + $0x78] sm:$0xff] }
  0x62   : > { %v3076_v19 = vld [vmem:[#allocation2 + $0x30] ss:$8 sps:$4 sm:$0xff]   ;;  %p3457_p4 = pneg %p3456_p2 }
  0x65   : > { %471 = vadd.xlane.f32.xlu0 %v451_v4  ;;  %473 = vadd.xlane.f32.xlu1 %v452_v5 }
  0x69   : > { %475 = vadd.xlane.f32.xlu0 %v453_v6  ;;  %477 = vadd.xlane.f32.xlu1 %v454_v7 }
  0x6d   : > { %479 = vadd.xlane.f32.xlu0 %v3732_v8  ;;  %481 = vadd.xlane.f32.xlu1 %v3735_v9 }
  0x71   : > { %483 = vadd.xlane.f32.xlu0 %v3738_v10  ;;  %485 = vadd.xlane.f32.xlu1 %v3741_v11 }
  0x75   : > { %487 = vadd.xlane.f32.xlu0 %v3746_v12  ;;  %489 = vadd.xlane.f32.xlu1 %v3749_v13 }
  0x79   : > { %491 = vadd.xlane.f32.xlu0 %v3754_v14  ;;  %493 = vadd.xlane.f32.xlu1 %v3757_v15 }
  0xe6   : > { %v464_v20 = vpop.xlane.xlu0 %463  ;;  %v468_v21 = vpop.xlane.xlu1 %467 }
  0xe7   : > { %v496_v22 = vmul.f32 0.0078125, %v464_v20  ;;  %v498_v23 = vmul.f32 0.0078125, %v468_v21 }
  0xe9   : > { %v3763_v24 = vsub.f32 %v447_v0, %v496_v22  ;;  %v3765_v25 = vsub.f32 %v449_v1, %v498_v23  ;;  %v3071_v1 = vld [vmem:[#allocation2 + $0x44] ss:$8 sps:$4 sm:$0xff]  }
  0xea   : > { %v466_v26 = vpop.xlane.xlu0 %465  ;;  %v470_v27 = vpop.xlane.xlu1 %469  ;;  %762 = vmatprep.subr.bf16.mxu0 %v3071_v1 }
  0xeb   : > { %v497_v28 = vmul.f32 0.0078125, %v466_v26  ;;  %v528_v29 = vmul.f32 %v3763_v24, %v3763_v24  ;;  %v499_v30 = vmul.f32 0.0078125, %v470_v27  ;;  %v530_v33 = vmul.f32 %v3765_v25, %v3765_v25 }
  0xed   : > { %v3769_v31 = vsub.f32 %v448_v2, %v497_v28  ;;  %544 = vadd.xlane.f32.xlu0 %v528_v29  ;;  %v3771_v32 = vsub.f32 %v450_v3, %v499_v30  ;;  %v3079_v29 = vld [vmem:[#allocation2 + $0x20] ss:$8 sps:$4 sm:$0xff]  }
  0xee   : > { %v472_v34 = vpop.xlane.xlu0 %471  ;;  %v474_v35 = vpop.xlane.xlu1 %473 }
  0xef   : > { %v500_v36 = vmul.f32 0.0078125, %v472_v34  ;;  %v529_v37 = vmul.f32 %v3769_v31, %v3769_v31  ;;  %v501_v38 = vmul.f32 0.0078125, %v474_v35  ;;  %v531_v41 = vmul.f32 %v3771_v32, %v3771_v32  ;;  %v3082_v34 = vld [vmem:[#allocation2 + $0x10] ss:$8 sps:$4 sm:$0xff]   ;;  %v3085_v35 = vld [vmem:[#allocation2] ss:$8 sps:$4 sm:$0xff]  }
  0xf1   : > { %v3777_v39 = vsub.f32 %v451_v4, %v500_v36  ;;  %548 = vadd.xlane.f32.xlu0 %v530_v33  ;;  %546 = vadd.xlane.f32.xlu1 %v529_v37  ;;  %v3779_v40 = vsub.f32 %v452_v5, %v501_v38  ;;  %v3073_v5 = vld [vmem:[#allocation2 + $0x40] ss:$8 sps:$4 sm:$0xff]   ;;  %v3080_v33 = vld [vmem:[#allocation2 + $0x14] ss:$8 sps:$4 sm:$0xff]   ;;  %v3538_v36 = vmov 0  }
  0xf2   : > { %v476_v42 = vpop.xlane.xlu0 %475  ;;  %v478_v43 = vpop.xlane.xlu1 %477  ;;  %763 = vmatpush1.bf16.msra.mxu0 %v3073_v5  ;;  %788 = vmatprep.mubr.bf16.mxu0 %v3538_v36 }
  0xf3   : > { %v502_v44 = vmul.f32 0.0078125, %v476_v42  ;;  %v532_v45 = vmul.f32 %v3777_v39, %v3777_v39  ;;  %v503_v46 = vmul.f32 0.0078125, %v478_v43  ;;  %v533_v49 = vmul.f32 %v3779_v40, %v3779_v40  ;;  %3061 = vset.pattern.permute.xlu1 %v3538_v36  ;;  %3060 = vset.pattern.permute.xlu0 %v3538_v36 }
  0xf5   : > { %v3785_v47 = vsub.f32 %v453_v6, %v502_v44  ;;  %550 = vadd.xlane.f32.xlu1 %v531_v41  ;;  %552 = vadd.xlane.f32.xlu0 %v532_v45  ;;  %v3787_v48 = vsub.f32 %v454_v7, %v503_v46 }
  0xf6   : > { %v480_v50 = vpop.xlane.xlu0 %479  ;;  %v482_v51 = vpop.xlane.xlu1 %481 }
  0xf7   : > { %v504_v52 = vmul.f32 0.0078125, %v480_v50  ;;  %v534_v53 = vmul.f32 %v3785_v47, %v3785_v47  ;;  %v505_v54 = vmul.f32 0.0078125, %v482_v51  ;;  %v535_v59 = vmul.f32 %v3787_v48, %v3787_v48 }
  0xf9   : > { %v3794_v57 = vsub.f32 %v3732_v8, %v504_v52  ;;  %554 = vadd.xlane.f32.xlu1 %v533_v49  ;;  %556 = vadd.xlane.f32.xlu0 %v534_v53  ;;  %v3797_v58 = vsub.f32 %v3735_v9, %v505_v54 }
  0xfa   : > { %v484_v60 = vpop.xlane.xlu0 %483  ;;  %v486_v61 = vpop.xlane.xlu1 %485 }
  0xfb   : > { %v506_v62 = vmul.f32 0.0078125, %v484_v60  ;;  %v536_v63 = vmul.f32 %v3794_v57, %v3794_v57  ;;  %v507_v0 = vmul.f32 0.0078125, %v486_v61  ;;  %v537_v4 = vmul.f32 %v3797_v58, %v3797_v58 }
  0xfd   : > { %v3804_v2 = vsub.f32 %v3738_v10, %v506_v62  ;;  %558 = vadd.xlane.f32.xlu1 %v535_v59  ;;  %560 = vadd.xlane.f32.xlu0 %v536_v63  ;;  %v3807_v3 = vsub.f32 %v3741_v11, %v507_v0  ;;  %v3074_v10 = vld [vmem:[#allocation2 + $0x34] ss:$8 sps:$4 sm:$0xff]  }
  0xfe   : > { %v488_v6 = vpop.xlane.xlu0 %487  ;;  %v490_v7 = vpop.xlane.xlu1 %489  ;;  %764 = vmatprep.subr.bf16.mxu0 %v3074_v10 }
  0xff   : > { %v508_v8 = vmul.f32 0.0078125, %v488_v6  ;;  %v538_v9 = vmul.f32 %v3804_v2, %v3804_v2  ;;  %v509_v16 = vmul.f32 0.0078125, %v490_v7  ;;  %v539_v18 = vmul.f32 %v3807_v3, %v3807_v3  ;;  %765 = vmatpush1.bf16.msra.mxu0 %v3076_v19 }
 0x101   : > { %v3814_v17 = vsub.f32 %v3746_v12, %v508_v8  ;;  %562 = vadd.xlane.f32.xlu1 %v537_v4  ;;  %564 = vadd.xlane.f32.xlu0 %v538_v9  ;;  %v3817_v11 = vsub.f32 %v3749_v13, %v509_v16  ;;  %v3077_v12 = vld [vmem:[#allocation2 + $0x24] ss:$8 sps:$4 sm:$0xff]  }
 0x102   : > { %v492_v20 = vpop.xlane.xlu0 %491  ;;  %v494_v21 = vpop.xlane.xlu1 %493  ;;  %766 = vmatprep.subr.bf16.mxu0 %v3077_v12 }
 0x103   : > { %v510_v22 = vmul.f32 0.0078125, %v492_v20  ;;  %v540_v23 = vmul.f32 %v3814_v17, %v3814_v17  ;;  %v511_v26 = vmul.f32 0.0078125, %v494_v21  ;;  %v541_v28 = vmul.f32 %v3817_v11, %v3817_v11  ;;  %767 = vmatpush1.bf16.msra.mxu0 %v3079_v29 }
 0x104   : > { %768 = vmatprep.subr.bf16.mxu0 %v3080_v33 }
 0x105   : > { %v3824_v27 = vsub.f32 %v3754_v14, %v510_v22  ;;  %566 = vadd.xlane.f32.xlu1 %v539_v18  ;;  %568 = vadd.xlane.f32.xlu0 %v540_v23  ;;  %v3827_v13 = vsub.f32 %v3757_v15, %v511_v26  ;;  %v3083_v15 = vld [vmem:[#allocation2 + $0x4] ss:$8 sps:$4 sm:$0xff]  }
 0x107   : > { %v542_v30 = vmul.f32 %v3824_v27, %v3824_v27  ;;  %v543_v14 = vmul.f32 %v3827_v13, %v3827_v13  ;;  %769 = vmatpush1.bf16.msra.mxu0 %v3082_v34 }
 0x108   : > { %770 = vmatprep.subr.bf16.mxu0 %v3083_v15 }
 0x109   : > { %570 = vadd.xlane.f32.xlu1 %v541_v28  ;;  %572 = vadd.xlane.f32.xlu0 %v542_v30 }
 0x10b   : > { %771 = vmatpush1.bf16.msra.mxu0 %v3085_v35 }
 0x10d   : > { %574 = vadd.xlane.f32.xlu1 %v543_v14 }
 0x176   : > { %v545_v37 = vpop.xlane.xlu0 %544 }
 0x177   : > { %v576_v38 = vmul.f32 0.0078125, %v545_v37 }
 0x179   : > { %v592_v41 = vadd.f32 1e-05, %v576_v38 }
 0x17a   : > { %v547_v42 = vpop.xlane.xlu1 %546  ;;  %v549_v43 = vpop.xlane.xlu0 %548 }
 0x17b   : > { %v577_v44 = vmul.f32 0.0078125, %v547_v42  ;;  %3166 = vrsqrt.f32 %v592_v41  ;;  %v578_v46 = vmul.f32 0.0078125, %v549_v43 }
 0x17d   : > { %v593_v45 = vadd.f32 1e-05, %v577_v44  ;;  %v594_v51 = vadd.f32 1e-05, %v578_v46 }
 0x17e   : > { %v551_v49 = vpop.xlane.xlu1 %550  ;;  %v553_v53 = vpop.xlane.xlu0 %552 }
 0x17f   : > { %3168 = vrsqrt.f32 %v593_v45  ;;  %v579_v50 = vmul.f32 0.0078125, %v551_v49  ;;  %v580_v56 = vmul.f32 0.0078125, %v553_v53 }
 0x181   : > { %v595_v52 = vadd.f32 1e-05, %v579_v50  ;;  %v596_v61 = vadd.f32 1e-05, %v580_v56 }
 0x182   : > { %v555_v54 = vpop.xlane.xlu1 %554  ;;  %v557_v63 = vpop.xlane.xlu0 %556 }
 0x183   : > { %3170 = vrsqrt.f32 %v595_v52  ;;  %v581_v55 = vmul.f32 0.0078125, %v555_v54  ;;  %v582_v4 = vmul.f32 0.0078125, %v557_v63 }
 0x184   : > { %3172 = vrsqrt.f32 %v594_v51 }
 0x185   : > { %v597_v59 = vadd.f32 1e-05, %v581_v55  ;;  %v598_v10 = vadd.f32 1e-05, %v582_v4 }
 0x186   : > { %v559_v60 = vpop.xlane.xlu1 %558  ;;  %v561_v19 = vpop.xlane.xlu0 %560 }
 0x187   : > { %3174 = vrsqrt.f32 %v597_v59  ;;  %v583_v0 = vmul.f32 0.0078125, %v559_v60  ;;  %v584_v22 = vmul.f32 0.0078125, %v561_v19  ;;  %v3091_v19 = vld [vmem:[#allocation5 + $0x28] sm:$0xff]  }
 0x188   : > { %v3167_v62 = vpop.eup %3166  ;;  %3176 = vrsqrt.f32 %v596_v61 }
 0x189   : > { %v624_v5 = vmul.f32 %v3167_v62, %v3763_v24  ;;  %v599_v7 = vadd.f32 1e-05, %v583_v0  ;;  %v600_v28 = vadd.f32 1e-05, %v584_v22  ;;  %v3096_v22 = vld [vmem:[#allocation5 + $0x50] sm:$0xff]  }
 0x18a   : > { %v563_v16 = vpop.xlane.xlu1 %562  ;;  %v565_v30 = vpop.xlane.xlu0 %564 }
 0x18b   : > { %3178 = vrsqrt.f32 %v599_v7  ;;  %v585_v20 = vmul.f32 0.0078125, %v563_v16  ;;  %v3086_v16 = vld [vmem:[#allocation5 + $0x78] sm:$0xff]  }
 0x18c   : > { %v3169_v1 = vpop.eup %3168  ;;  %3180 = vrsqrt.f32 %v598_v10  ;;  %v3087_v10 = vld [vmem:[#allocation5 + $0x38] sm:$0xff]   ;;  %2811 = vmatprep.subr.bf16.mxu1 %v3086_v16 }
 0x18d   : > { %v625_v6 = vmul.f32 %v3169_v1, %v3769_v31  ;;  %v601_v23 = vadd.f32 1e-05, %v585_v20  ;;  %2812 = vmatpush3.bf16.msra.mxu1 %v3087_v10  ;;  %v3092_v20 = vld [vmem:[#allocation5 + $0x60] sm:$0xff]  }
 0x18e   : > { %v567_v12 = vpop.xlane.xlu1 %566  ;;  %v569_v42 = vpop.xlane.xlu0 %568 }
 0x18f   : > { %v640_v8 = vpack.c.bf16 %v625_v6, %v624_v5  ;;  %3182 = vrsqrt.f32 %v601_v23  ;;  %v587_v33 = vmul.f32 0.0078125, %v567_v12  ;;  %v3098_v23 = vld [vmem:[#allocation5 + $0x48] sm:$0xff]   ;;  %v3101_v12 = vld [vmem:[#allocation5] sm:$0xff]  }
 0x190   : > { %v3171_v9 = vpop.eup %3170  ;;  %3184 = vrsqrt.f32 %v600_v28  ;;  %v666_v28 = vlaneseq }
 0x191   : > { %789 = vmatmul.mubr.bf16.vlgmr.msra.gmra.mxu0 %v640_v8  ;;  %v3173_v18 = vpop.eup %3172  ;;  %v627_v21 = vmul.f32 %v3171_v9, %v3771_v32  ;;  %v586_v32 = vmul.f32 0.0078125, %v565_v30  ;;  %v603_v15 = vadd.f32 1e-05, %v587_v33  ;;  %v664_v33 = vld [vmem:[%s4554_s3] sm:$0x3] }
 0x192   : > { %798 = vmatprep.mubr.bf16.mxu0 %v3538_v36  ;;  %v626_v24 = vmul.f32 %v3173_v18, %v3765_v25  ;;  %v571_v37 = vpop.xlane.xlu1 %570  ;;  %v573_v53 = vpop.xlane.xlu0 %572  ;;  %v3090_v18 = vld [vmem:[#allocation5 + $0x68] sm:$0xff]  }
 0x193   : > { %v602_v38 = vadd.f32 1e-05, %v586_v32  ;;  %3186 = vrsqrt.f32 %v603_v15  ;;  %v589_v43 = vmul.f32 0.0078125, %v571_v37 }
 0x194   : > { %v641_v31 = vpack.c.bf16 %v627_v21, %v626_v24  ;;  %v3175_v26 = vpop.eup %3174  ;;  %v3095_v21 = vld [vmem:[#allocation5 + $0x18] sm:$0xff]   ;;  %v3097_v24 = vld [vmem:[#allocation5 + $0x10] sm:$0xff]  }
 0x195   : > { %v3177_v29 = vpop.eup %3176  ;;  %v629_v14 = vmul.f32 %v3175_v26, %v3779_v40  ;;  %3188 = vrsqrt.f32 %v602_v38  ;;  %v588_v40 = vmul.f32 0.0078125, %v569_v42  ;;  %v605_v46 = vadd.f32 1e-05, %v589_v43  ;;  %v3100_v26 = vld [vmem:[#allocation5 + $0x40] sm:$0xff]  }
 0x196   : > { %v628_v34 = vmul.f32 %v3177_v29, %v3777_v39  ;;  %v575_v50 = vpop.xlane.xlu1 %574  ;;  %v3862_v29 = vshrl.u32 %v666_v28, 7 }
 0x197   : > { %v604_v51 = vadd.f32 1e-05, %v588_v40  ;;  %3190 = vrsqrt.f32 %v605_v46  ;;  %v591_v54 = vmul.f32 0.0078125, %v575_v50 }
 0x198   : > { %v642_v25 = vpack.c.bf16 %v629_v14, %v628_v34  ;;  %v3179_v35 = vpop.eup %3178  ;;  %v668_v30 = vsub.s32 0, %v3862_v29  ;;  %v672_v14 = vsub.s32 1, %v3862_v29 }
 0x199   : > { %799 = vmatmul.mubr.bf16.gmra.mxu0 %v641_v31  ;;  %v3181_v41 = vpop.eup %3180  ;;  %v631_v44 = vmul.f32 %v3179_v35, %v3787_v48  ;;  %3192 = vrsqrt.f32 %v604_v51  ;;  %v590_v48 = vmul.f32 0.0078125, %v573_v53  ;;  %v607_v59 = vadd.f32 1e-05, %v591_v54  ;;  %v3099_v31 = vld [vmem:[#allocation5 + $0x8] sm:$0xff]  }
 0x19a   : > { %808 = vmatprep.mubr.bf16.mxu0 %v3538_v36  ;;  %v630_v45 = vmul.f32 %v3181_v41, %v3785_v47  ;;  %v3871_v34 = vrot.slane %v664_v33, %v668_v30 }
 0x19b   : > { %v606_v61 = vadd.f32 1e-05, %v590_v48  ;;  %3194 = vrsqrt.f32 %v607_v59 }
 0x19c   : > { %v643_v39 = vpack.c.bf16 %v631_v44, %v630_v45  ;;  %v3183_v49 = vpop.eup %3182 }
 0x19d   : > { %v3185_v52 = vpop.eup %3184  ;;  %v633_v55 = vmul.f32 %v3183_v49, %v3797_v58  ;;  %3196 = vrsqrt.f32 %v606_v61 }
 0x19e   : > { %v632_v56 = vmul.f32 %v3185_v52, %v3794_v57 }
 0x1a0   : > { %v644_v47 = vpack.c.bf16 %v633_v55, %v632_v56  ;;  %v3187_v60 = vpop.eup %3186 }
 0x1a1   : > { %809 = vmatmul.mubr.bf16.gmra.mxu0 %v642_v25  ;;  %v635_v63 = vmul.f32 %v3187_v60, %v3807_v3  ;;  %v3875_v25 = vrot.slane %v664_v33, %v672_v14 }
 0x1a2   : > { %818 = vmatprep.mubr.bf16.mxu0 %v3538_v36  ;;  %v3189_v62 = vpop.eup %3188 }
 0x1a3   : > { %v634_v0 = vmul.f32 %v3189_v62, %v3804_v2 }
 0x1a4   : > { %v3191_v58 = vpop.eup %3190 }
 0x1a5   : > { %v645_v1 = vpack.c.bf16 %v635_v63, %v634_v0  ;;  %v637_v57 = vmul.f32 %v3191_v58, %v3817_v11  ;;  %v3088_v11 = vld [vmem:[#allocation5 + $0x70] sm:$0xff]  }
 0x1a6   : > { %v3193_v4 = vpop.eup %3192  ;;  %2813 = vmatprep.subr.bf16.mxu1 %v3088_v11 }
 0x1a7   : > { %v636_v5 = vmul.f32 %v3193_v4, %v3814_v17  ;;  %v3089_v17 = vld [vmem:[#allocation5 + $0x30] sm:$0xff]  }
 0x1a8   : > { %v3195_v7 = vpop.eup %3194  ;;  %2814 = vmatpush3.bf16.msra.mxu1 %v3089_v17 }
 0x1a9   : > { %819 = vmatmul.mubr.bf16.gmra.mxu0 %v643_v39  ;;  %v646_v6 = vpack.c.bf16 %v637_v57, %v636_v5  ;;  %v639_v3 = vmul.f32 %v3195_v7, %v3827_v13  ;;  %2815 = vmatprep.subr.bf16.mxu1 %v3090_v18  ;;  %v3093_v13 = vld [vmem:[#allocation5 + $0x20] sm:$0xff]  }
 0x1aa   : > { %828 = vmatprep.mubr.bf16.mxu0 %v3538_v36  ;;  %v3197_v8 = vpop.eup %3196 }
 0x1ab   : > { %v638_v2 = vmul.f32 %v3197_v8, %v3824_v27  ;;  %v3094_v27 = vld [vmem:[#allocation5 + $0x58] sm:$0xff]  }
 0x1ac   : > { %2816 = vmatpush3.bf16.msra.mxu1 %v3091_v19 }
 0x1ad   : > { %v647_v9 = vpack.c.bf16 %v639_v3, %v638_v2  ;;  %2817 = vmatprep.subr.bf16.mxu1 %v3092_v20 }
 0x1b0   : > { %2818 = vmatpush3.bf16.msra.mxu1 %v3093_v13 }
 0x1b1   : > { %829 = vmatmul.mubr.bf16.gmra.mxu0 %v644_v47  ;;  %2819 = vmatprep.subr.bf16.mxu1 %v3094_v27 }
 0x1b2   : > { %838 = vmatprep.mubr.bf16.mxu0 %v3538_v36 }
 0x1b4   : > { %2820 = vmatpush3.bf16.msra.mxu1 %v3095_v21 }
 0x1b5   : > { %2821 = vmatprep.subr.bf16.mxu1 %v3096_v22 }
 0x1b8   : > { %2822 = vmatpush3.bf16.msra.mxu1 %v3097_v24 }
 0x1b9   : > { %839 = vmatmul.mubr.bf16.gmra.mxu0 %v645_v1  ;;  %2823 = vmatprep.subr.bf16.mxu1 %v3098_v23 }
 0x1ba   : > { %848 = vmatprep.mubr.bf16.mxu0 %v3538_v36 }
 0x1bc   : > { %2824 = vmatpush3.bf16.msra.mxu1 %v3099_v31 }
 0x1bd   : > { %2825 = vmatprep.subr.bf16.mxu1 %v3100_v26 }
 0x1c0   : > { %2826 = vmatpush3.bf16.msra.mxu1 %v3101_v12 }
 0x1c1   : > { %849 = vmatmul.mubr.bf16.gmra.mxu0 %v646_v6 }
 0x1c2   : > { %858 = vmatprep.mubr.bf16.mxu0 %v3538_v36 }
 0x1c9   : > { %859 = vmatmul.mubr.bf16.gmra.mxu0 %v647_v9 }
 0x1ca   : > { %1550 = vmatprep.mubr.bf16.mxu0 %v3538_v36 }
 0x251   : > { %v790_v32 = vpop.f32.mrf.mxu0 }
 0x252   : > { %v791_v37 = vadd.f32 %v790_v32, %v3871_v34 }
 0x253   : > { %v792_v15 = vpop.f32.mrf.mxu0 }
 0x254   : > { %v793_v42 = vadd.f32 %v792_v15, %v3875_v25 }
 0x255   : > { %v794_v35 = vpop.f32.mrf.mxu0 }
 0x256   : > { %v795_v38 = vadd.f32 %v794_v35, %v3871_v34 }
 0x257   : > { %v796_v41 = vpop.f32.mrf.mxu0 }
 0x258   : > { %v3880_v43 = vpack.c.bf16 %v795_v38, %v791_v37  ;;  %v797_v44 = vadd.f32 %v796_v41, %v3875_v25 }
 0x259   : > { %v800_v40 = vpop.f32.mrf.mxu0 }
 0x25a   : > { %v885_v45 = vmul.bf16 %v3880_v43, %v3880_v43  ;;  %v3885_v46 = vpack.c.bf16 %v797_v44, %v793_v42  ;;  %v801_v53 = vadd.f32 %v800_v40, %v3871_v34 }
 0x25b   : > { %v802_v39 = vpop.f32.mrf.mxu0 }
 0x25c   : > { %v901_v49 = vmul.bf16 %v885_v45, %v3880_v43  ;;  %v886_v50 = vmul.bf16 %v3885_v46, %v3885_v46  ;;  %v803_v48 = vadd.f32 %v802_v39, %v3875_v25 }
 0x25d   : > { %v804_v51 = vpop.f32.mrf.mxu0 }
 0x25e   : > { %v917_v52 = vmul.bf16 1027030327, %v901_v49  ;;  %v805_v54 = vadd.f32 %v804_v51, %v3871_v34  ;;  %v902_v55 = vmul.bf16 %v886_v50, %v3885_v46 }
 0x25f   : > { %v806_v56 = vpop.f32.mrf.mxu0 }
 0x260   : > { %v933_v59 = vadd.bf16 %v917_v52, %v3880_v43  ;;  %v3895_v47 = vpack.c.bf16 %v805_v54, %v801_v53  ;;  %v807_v60 = vadd.f32 %v806_v56, %v3875_v25  ;;  %v918_v61 = vmul.bf16 1027030327, %v902_v55 }
 0x261   : > { %v810_v62 = vpop.f32.mrf.mxu0 }
 0x262   : > { %v887_v63 = vmul.bf16 %v3895_v47, %v3895_v47  ;;  %v3900_v0 = vpack.c.bf16 %v807_v60, %v803_v48  ;;  %v934_v1 = vadd.bf16 %v918_v61, %v3885_v46  ;;  %v949_v4 = vmul.bf16 1061961548, %v933_v59 }
 0x263   : > { %v812_v58 = vpop.f32.mrf.mxu0  ;;  %v811_v7 = vadd.f32 %v810_v62, %v3871_v34 }
 0x264   : > { %v903_v57 = vmul.bf16 %v887_v63, %v3895_v47  ;;  %v888_v5 = vmul.bf16 %v3900_v0, %v3900_v0  ;;  %v950_v6 = vmul.bf16 1061961548, %v934_v1  ;;  %3198 = vtanh.bf16 %v949_v4 }
 0x265   : > { %v814_v8 = vpop.f32.mrf.mxu0  ;;  %v813_v16 = vadd.f32 %v812_v58, %v3875_v25 }
 0x266   : > { %v919_v3 = vmul.bf16 1027030327, %v903_v57  ;;  %v904_v2 = vmul.bf16 %v888_v5, %v3900_v0  ;;  %v815_v9 = vadd.f32 %v814_v8, %v3871_v34  ;;  %3200 = vtanh.bf16 %v950_v6 }
 0x267   : > { %v816_v10 = vpop.f32.mrf.mxu0 }
 0x268   : > { %v935_v11 = vadd.bf16 %v919_v3, %v3895_v47  ;;  %v920_v17 = vmul.bf16 1027030327, %v904_v2  ;;  %v3911_v18 = vpack.c.bf16 %v815_v9, %v811_v7  ;;  %v817_v19 = vadd.f32 %v816_v10, %v3875_v25 }
 0x269   : > { %v820_v20 = vpop.f32.mrf.mxu0 }
 0x26a   : > { %v936_v13 = vadd.bf16 %v920_v17, %v3900_v0  ;;  %v889_v27 = vmul.bf16 %v3911_v18, %v3911_v18  ;;  %v3917_v21 = vpack.c.bf16 %v817_v19, %v813_v16  ;;  %v951_v24 = vmul.bf16 1061961548, %v935_v11 }
 0x26b   : > { %v822_v22 = vpop.f32.mrf.mxu0  ;;  %v821_v12 = vadd.f32 %v820_v20, %v3871_v34 }
 0x26c   : > { %v905_v23 = vmul.bf16 %v889_v27, %v3911_v18  ;;  %v890_v31 = vmul.bf16 %v3917_v21, %v3917_v21  ;;  %v952_v26 = vmul.bf16 1061961548, %v936_v13  ;;  %3202 = vtanh.bf16 %v951_v24 }
 0x26d   : > { %v824_v28 = vpop.f32.mrf.mxu0  ;;  %v823_v35 = vadd.f32 %v822_v22, %v3875_v25 }
 0x26e   : > { %v921_v33 = vmul.bf16 1027030327, %v905_v23  ;;  %v906_v32 = vmul.bf16 %v890_v31, %v3917_v21  ;;  %v825_v15 = vadd.f32 %v824_v28, %v3871_v34  ;;  %3204 = vtanh.bf16 %v952_v26 }
 0x26f   : > { %v826_v37 = vpop.f32.mrf.mxu0 }
 0x270   : > { %v937_v38 = vadd.bf16 %v921_v33, %v3911_v18  ;;  %v922_v41 = vmul.bf16 1027030327, %v906_v32  ;;  %v3927_v42 = vpack.c.bf16 %v825_v15, %v821_v12  ;;  %v827_v44 = vadd.f32 %v826_v37, %v3875_v25 }
 0x271   : > { %v830_v40 = vpop.f32.mrf.mxu0 }
 0x272   : > { %v938_v45 = vadd.bf16 %v922_v41, %v3917_v21  ;;  %v891_v39 = vmul.bf16 %v3927_v42, %v3927_v42  ;;  %v3933_v49 = vpack.c.bf16 %v827_v44, %v823_v35  ;;  %v3199_v50 = vpop.eup %3198  ;;  %v953_v52 = vmul.bf16 1061961548, %v937_v38 }
 0x273   : > { %v832_v51 = vpop.f32.mrf.mxu0  ;;  %v981_v48 = vadd.bf16 1065369472, %v3199_v50  ;;  %v831_v56 = vadd.f32 %v830_v40, %v3871_v34 }
 0x274   : > { %v3201_v53 = vpop.eup %3200  ;;  %v907_v54 = vmul.bf16 %v891_v39, %v3927_v42  ;;  %v892_v55 = vmul.bf16 %v3933_v49, %v3933_v49  ;;  %v954_v61 = vmul.bf16 1061961548, %v938_v45  ;;  %3206 = vtanh.bf16 %v953_v52 }
 0x275   : > { %v834_v59 = vpop.f32.mrf.mxu0  ;;  %v982_v60 = vadd.bf16 1065369472, %v3201_v53  ;;  %v997_v58 = vmul.bf16 1056980736, %v981_v48  ;;  %v833_v4 = vadd.f32 %v832_v51, %v3875_v25 }
 0x276   : > { %v923_v62 = vmul.bf16 1027030327, %v907_v54  ;;  %v908_v63 = vmul.bf16 %v892_v55, %v3933_v49  ;;  %v835_v1 = vadd.f32 %v834_v59, %v3871_v34  ;;  %3208 = vtanh.bf16 %v954_v61 }
 0x277   : > { %v836_v57 = vpop.f32.mrf.mxu0  ;;  %v998_v5 = vmul.bf16 1056980736, %v982_v60  ;;  %v1013_v17 = vmul.bf16 %v997_v58, %v3880_v43 }
 0x278   : > { %v939_v6 = vadd.bf16 %v923_v62, %v3927_v42  ;;  %v924_v7 = vmul.bf16 1027030327, %v908_v63  ;;  %v3943_v8 = vpack.c.bf16 %v835_v1, %v831_v56  ;;  %v837_v3 = vadd.f32 %v836_v57, %v3875_v25 }
 0x279   : > { %v840_v2 = vpop.f32.mrf.mxu0  ;;  %v1014_v9 = vmul.bf16 %v998_v5, %v3885_v46 }
 0x27a   : > { %v940_v16 = vadd.bf16 %v924_v7, %v3933_v49  ;;  %v893_v10 = vmul.bf16 %v3943_v8, %v3943_v8  ;;  %v3950_v11 = vpack.c.bf16 %v837_v3, %v833_v4  ;;  %v3203_v19 = vpop.eup %3202  ;;  %v955_v13 = vmul.bf16 1061961548, %v939_v6 }
 0x27b   : > { %v842_v20 = vpop.f32.mrf.mxu0  ;;  %1196 = vmatprep.mubr.bf16.mxu1 %v1014_v9  ;;  %v983_v46 = vadd.bf16 1065369472, %v3203_v19  ;;  %v841_v23 = vadd.f32 %v840_v2, %v3871_v34 }
 0x27c   : > { %v3205_v27 = vpop.eup %3204  ;;  %v909_v22 = vmul.bf16 %v893_v10, %v3943_v8  ;;  %v894_v24 = vmul.bf16 %v3950_v11, %v3950_v11  ;;  %1197 = vmatmul.mubr.bf16.vlgmr.msra.gmra.mxu1 %v1013_v17  ;;  %v956_v12 = vmul.bf16 1061961548, %v940_v16  ;;  %3210 = vtanh.bf16 %v955_v13 }
 0x27d   : > { %v844_v31 = vpop.f32.mrf.mxu0  ;;  %v984_v26 = vadd.bf16 1065369472, %v3205_v27  ;;  %v999_v32 = vmul.bf16 1056980736, %v983_v46  ;;  %v843_v15 = vadd.f32 %v842_v20, %v3875_v25 }
 0x27e   : > { %v925_v28 = vmul.bf16 1027030327, %v909_v22  ;;  %v910_v43 = vmul.bf16 %v894_v24, %v3950_v11  ;;  %v845_v33 = vadd.f32 %v844_v31, %v3871_v34  ;;  %3212 = vtanh.bf16 %v956_v12 }
 0x27f   : > { %v846_v35 = vpop.f32.mrf.mxu0  ;;  %v1000_v37 = vmul.bf16 1056980736, %v984_v26  ;;  %v1015_v53 = vmul.bf16 %v999_v32, %v3895_v47 }
 0x280   : > { %v941_v38 = vadd.bf16 %v925_v28, %v3943_v8  ;;  %v926_v41 = vmul.bf16 1027030327, %v910_v43  ;;  %v3961_v44 = vpack.c.bf16 %v845_v33, %v841_v23  ;;  %v847_v40 = vadd.f32 %v846_v35, %v3875_v25 }
 0x281   : > { %v850_v45 = vpop.f32.mrf.mxu0  ;;  %v1016_v39 = vmul.bf16 %v1000_v37, %v3900_v0 }
 0x282   : > { %v942_v50 = vadd.bf16 %v926_v41, %v3950_v11  ;;  %v895_v51 = vmul.bf16 %v3961_v44, %v3961_v44  ;;  %v3968_v52 = vpack.c.bf16 %v847_v40, %v843_v15  ;;  %v3207_v54 = vpop.eup %3206  ;;  %v957_v48 = vmul.bf16 1061961548, %v941_v38 }
 0x283   : > { %v852_v55 = vpop.f32.mrf.mxu0  ;;  %1204 = vmatprep.mubr.bf16.mxu1 %v1016_v39  ;;  %v985_v0 = vadd.bf16 1065369472, %v3207_v54  ;;  %v851_v61 = vadd.f32 %v850_v45, %v3871_v34 }
 0x284   : > { %v911_v56 = vmul.bf16 %v895_v51, %v3961_v44  ;;  %v896_v59 = vmul.bf16 %v3968_v52, %v3968_v52  ;;  %1205 = vmatmul.mubr.bf16.gmra.mxu1 %v1015_v53  ;;  %v3209_v60 = vpop.eup %3208  ;;  %v958_v63 = vmul.bf16 1061961548, %v942_v50  ;;  %3214 = vtanh.bf16 %v957_v48 }
 0x285   : > { %v854_v62 = vpop.f32.mrf.mxu0  ;;  %v986_v4 = vadd.bf16 1065369472, %v3209_v60  ;;  %v853_v57 = vadd.f32 %v852_v55, %v3875_v25  ;;  %v1001_v6 = vmul.bf16 1056980736, %v985_v0 }
 0x286   : > { %v927_v1 = vmul.bf16 1027030327, %v911_v56  ;;  %v912_v47 = vmul.bf16 %v896_v59, %v3968_v52  ;;  %v855_v58 = vadd.f32 %v854_v62, %v3871_v34  ;;  %3216 = vtanh.bf16 %v958_v63 }
 0x287   : > { %v856_v5 = vpop.f32.mrf.mxu0  ;;  %v1002_v10 = vmul.bf16 1056980736, %v986_v4  ;;  %v1017_v31 = vmul.bf16 %v1001_v6, %v3911_v18 }
 0x288   : > { %v943_v7 = vadd.bf16 %v927_v1, %v3961_v44  ;;  %v928_v3 = vmul.bf16 1027030327, %v912_v47  ;;  %v3979_v2 = vpack.c.bf16 %v855_v58, %v851_v61  ;;  %v857_v9 = vadd.f32 %v856_v5, %v3875_v25 }
 0x289   : > { %v860_v16 = vpop.f32.mrf.mxu0  ;;  %v1018_v22 = vmul.bf16 %v1002_v10, %v3917_v21 }
 0x28a   : > { %v944_v17 = vadd.bf16 %v928_v3, %v3968_v52  ;;  %v897_v19 = vmul.bf16 %v3979_v2, %v3979_v2  ;;  %v3985_v20 = vpack.c.bf16 %v857_v9, %v853_v57  ;;  %v3211_v13 = vpop.eup %3210  ;;  %v959_v24 = vmul.bf16 1061961548, %v943_v7 }
 0x28b   : > { %v862_v27 = vpop.f32.mrf.mxu0  ;;  %v987_v26 = vadd.bf16 1065369472, %v3211_v13  ;;  %v861_v28 = vadd.f32 %v860_v16, %v3871_v34  ;;  %1212 = vmatprep.mubr.bf16.mxu1 %v1018_v22 }
 0x28c   : > { %v913_v46 = vmul.bf16 %v897_v19, %v3979_v2  ;;  %v898_v23 = vmul.bf16 %v3985_v20, %v3985_v20  ;;  %v3213_v12 = vpop.eup %3212  ;;  %v960_v33 = vmul.bf16 1061961548, %v944_v17  ;;  %3218 = vtanh.bf16 %v959_v24  ;;  %1213 = vmatmul.mubr.bf16.gmra.mxu1 %v1017_v31 }
 0x28d   : > { %v864_v43 = vpop.f32.mrf.mxu0  ;;  %v988_v35 = vadd.bf16 1065369472, %v3213_v12  ;;  %v863_v37 = vadd.f32 %v862_v27, %v3875_v25  ;;  %v1003_v41 = vmul.bf16 1056980736, %v987_v26 }
 0x28e   : > { %v929_v32 = vmul.bf16 1027030327, %v913_v46  ;;  %v914_v15 = vmul.bf16 %v898_v23, %v3985_v20  ;;  %v865_v21 = vadd.f32 %v864_v43, %v3871_v34  ;;  %3220 = vtanh.bf16 %v960_v33 }
 0x28f   : > { %v866_v38 = vpop.f32.mrf.mxu0  ;;  %v1004_v50 = vmul.bf16 1056980736, %v988_v35  ;;  %v1019_v56 = vmul.bf16 %v1003_v41, %v3927_v42  ;;  %v3103_v35 = vld [vmem:[#allocation7 + $0xa8] ss:$12 sps:$4 sm:$0xff]   ;;  %v3110_v41 = vld [vmem:[#allocation7 + $0x78] ss:$12 sps:$4 sm:$0xff]  }
 0x290   : > { %v945_v18 = vadd.bf16 %v929_v32, %v3979_v2  ;;  %v930_v40 = vmul.bf16 1027030327, %v914_v15  ;;  %v3997_v45 = vpack.c.bf16 %v865_v21, %v861_v28  ;;  %v867_v39 = vadd.f32 %v866_v38, %v3875_v25  ;;  %v3105_v21 = vld [vmem:[#allocation7 + $0xac] ss:$12 sps:$4 sm:$0xff]   ;;  %v3102_v38 = vld [vmem:[#allocation7 + $0xb0] ss:$12 sps:$4 sm:$0xff]  }
 0x291   : > { %v1020_v48 = vmul.bf16 %v1004_v50, %v3933_v49  ;;  %1518 = vmatprep.subr.bf16.mxu0 %v3105_v21  ;;  %2907 = vmatprep.subr.bf16.mxu1 %v3102_v38  ;;  %v3119_v50 = vld [vmem:[#allocation7 + $0x4c] ss:$12 sps:$4 sm:$0xff]  }
 0x292   : > { %v946_v51 = vadd.bf16 %v930_v40, %v3985_v20  ;;  %v899_v53 = vmul.bf16 %v3997_v45, %v3997_v45  ;;  %v884_v34 = vpack.c.bf16 %v867_v39, %v863_v37  ;;  %v961_v54 = vmul.bf16 1061961548, %v945_v18  ;;  %v3215_v55 = vpop.eup %3214  ;;  %1519 = vmatpush1.bf16.msra.mxu0 %v3103_v35  ;;  %v3108_v37 = vld [vmem:[#allocation7 + $0x94] ss:$12 sps:$4 sm:$0xff]   ;;  %2908 = vmatpush3.bf16.msra.mxu1 %v3102_v38  ;;  %v3109_v18 = vld [vmem:[#allocation7 + $0x98] ss:$12 sps:$4 sm:$0xff]  }
 0x293   : > { %v989_v60 = vadd.bf16 1065369472, %v3215_v55  ;;  %1220 = vmatprep.mubr.bf16.mxu1 %v1020_v48  ;;  %1520 = vmatprep.subr.bf16.mxu0 %v3108_v37  ;;  %v3115_v40 = vld [vmem:[#allocation7 + $0x64] ss:$12 sps:$4 sm:$0xff]   ;;  %v3113_v39 = vld [vmem:[#allocation7 + $0x60] ss:$12 sps:$4 sm:$0xff]  }
 0x294   : > { %v915_v59 = vmul.bf16 %v899_v53, %v3997_v45  ;;  %v900_v0 = vmul.bf16 %v884_v34, %v884_v34  ;;  %v962_v61 = vmul.bf16 1061961548, %v946_v51  ;;  %v3217_v62 = vpop.eup %3216  ;;  %3222 = vtanh.bf16 %v961_v54  ;;  %1221 = vmatmul.mubr.bf16.gmra.mxu1 %v1019_v56  ;;  %2909 = vmatprep.subr.bf16.mxu1 %v3109_v18  ;;  %v3117_v51 = vld [vmem:[#allocation7 + $0x48] ss:$12 sps:$4 sm:$0xff]   ;;  %v3120_v54 = vld [vmem:[#allocation7 + $0x30] ss:$12 sps:$4 sm:$0xff]  }
 0x295   : > { %v990_v1 = vadd.bf16 1065369472, %v3217_v62  ;;  %v1005_v49 = vmul.bf16 1056980736, %v989_v60  ;;  %v3122_v53 = vld [vmem:[#allocation7 + $0x34] ss:$12 sps:$4 sm:$0xff]  }
 0x296   : > { %v931_v25 = vmul.bf16 1027030327, %v915_v59  ;;  %v916_v63 = vmul.bf16 %v900_v0, %v884_v34  ;;  %3224 = vtanh.bf16 %v962_v61  ;;  %2910 = vmatpush3.bf16.msra.mxu1 %v3109_v18  ;;  %v3126_v55 = vld [vmem:[#allocation7 + $0x1c] ss:$12 sps:$4 sm:$0xff]   ;;  %v3124_v56 = vld [vmem:[#allocation7 + $0x18] ss:$12 sps:$4 sm:$0xff]  }
 0x297   : > { %v1006_v4 = vmul.bf16 1056980736, %v990_v1  ;;  %v1021_v7 = vmul.bf16 %v1005_v49, %v3943_v8  ;;  %v3127_v48 = vld [vmem:[#allocation7 + $0x50] ss:$12 sps:$4 sm:$0xff]   ;;  %v3131_v0 = vld [vmem:[#allocation7 + $0x38] ss:$12 sps:$4 sm:$0xff]  }
 0x298   : > { %v947_v47 = vadd.bf16 %v931_v25, %v3997_v45  ;;  %v932_v58 = vmul.bf16 1027030327, %v916_v63  ;;  %v3130_v59 = vld [vmem:[#allocation7 + $0x4] ss:$12 sps:$4 sm:$0xff]   ;;  %v3128_v60 = vld [vmem:[#allocation7] ss:$12 sps:$4 sm:$0xff]  }
 0x299   : > { %v1022_v42 = vmul.bf16 %v1006_v4, %v3950_v11  ;;  %v3132_v61 = vld [vmem:[#allocation7 + $0x20] ss:$12 sps:$4 sm:$0xff]   ;;  %v3133_v62 = vld [vmem:[#allocation7 + $0x8] ss:$12 sps:$4 sm:$0xff]  }
 0x29a   : > { %v948_v57 = vadd.bf16 %v932_v58, %v884_v34  ;;  %v963_v5 = vmul.bf16 1061961548, %v947_v47  ;;  %v3219_v6 = vpop.eup %3218  ;;  %v3136_v25 = vld [vmem:[#allocation8 + $0x74] ss:$8 sps:$4 sm:$0xff]   ;;  %v4017_v4 = vld [vmem:[%s4556_s5] ss:$0 sm:$0xff] }
 0x29b   : > { %1228 = vmatprep.mubr.bf16.mxu1 %v1022_v42  ;;  %v991_v3 = vadd.bf16 1065369472, %v3219_v6 }
 0x29c   : > { %v964_v9 = vmul.bf16 1061961548, %v948_v57  ;;  %3226 = vtanh.bf16 %v963_v5  ;;  %v3221_v16 = vpop.eup %3220  ;;  %1229 = vmatmul.mubr.bf16.gmra.mxu1 %v1021_v7 }
 0x29d   : > { %v992_v10 = vadd.bf16 1065369472, %v3221_v16  ;;  %v1007_v19 = vmul.bf16 1056980736, %v991_v3 }
 0x29e   : > { %3228 = vtanh.bf16 %v964_v9 }
 0x29f   : > { %v1008_v17 = vmul.bf16 1056980736, %v992_v10  ;;  %v1023_v11 = vmul.bf16 %v1007_v19, %v3961_v44 }
 0x2a1   : > { %v1024_v13 = vmul.bf16 %v1008_v17, %v3968_v52 }
 0x2a2   : > { %v3223_v27 = vpop.eup %3222 }
 0x2a3   : > { %1236 = vmatprep.mubr.bf16.mxu1 %v1024_v13  ;;  %v993_v22 = vadd.bf16 1065369472, %v3223_v27 }
 0x2a4   : > { %v3225_v24 = vpop.eup %3224  ;;  %1237 = vmatmul.mubr.bf16.gmra.mxu1 %v1023_v11 }
 0x2a5   : > { %v994_v46 = vadd.bf16 1065369472, %v3225_v24  ;;  %v1009_v23 = vmul.bf16 1056980736, %v993_v22 }
 0x2a7   : > { %v1010_v8 = vmul.bf16 1056980736, %v994_v46  ;;  %v1025_v28 = vmul.bf16 %v1009_v23, %v3979_v2  ;;  %v3112_v2 = vld [vmem:[#allocation7 + $0x7c] ss:$12 sps:$4 sm:$0xff]  }
 0x2a9   : > { %v1026_v26 = vmul.bf16 %v1010_v8, %v3985_v20  ;;  %v3106_v20 = vld [vmem:[#allocation7 + $0x90] ss:$12 sps:$4 sm:$0xff]  }
 0x2aa   : > { %v3227_v31 = vpop.eup %3226  ;;  %1521 = vmatpush1.bf16.msra.mxu0 %v3106_v20 }
 0x2ab   : > { %1244 = vmatprep.mubr.bf16.mxu1 %v1026_v26  ;;  %v995_v43 = vadd.bf16 1065369472, %v3227_v31  ;;  %1522 = vmatprep.subr.bf16.mxu0 %v3112_v2 }
 0x2ac   : > { %v3229_v12 = vpop.eup %3228  ;;  %1245 = vmatmul.mubr.bf16.gmra.mxu1 %v1025_v28 }
 0x2ad   : > { %v996_v33 = vadd.bf16 1065369472, %v3229_v12  ;;  %v1011_v32 = vmul.bf16 1056980736, %v995_v43 }
 0x2ae   : > { %1523 = vmatpush1.bf16.msra.mxu0 %v3110_v41 }
 0x2af   : > { %v1012_v52 = vmul.bf16 1056980736, %v996_v33  ;;  %v1027_v44 = vmul.bf16 %v1011_v32, %v3997_v45  ;;  %1524 = vmatprep.subr.bf16.mxu0 %v3115_v40  ;;  %v3116_v45 = vld [vmem:[#allocation7 + $0x80] ss:$12 sps:$4 sm:$0xff]  }
 0x2b0   : > { %2911 = vmatprep.subr.bf16.mxu1 %v3116_v45 }
 0x2b1   : > { %v1028_v15 = vmul.bf16 %v1012_v52, %v884_v34  ;;  %2912 = vmatpush3.bf16.msra.mxu1 %v3116_v45  ;;  %v3123_v34 = vld [vmem:[#allocation7 + $0x68] ss:$12 sps:$4 sm:$0xff]  }
 0x2b2   : > { %1525 = vmatpush1.bf16.msra.mxu0 %v3113_v39  ;;  %2913 = vmatprep.subr.bf16.mxu1 %v3123_v34 }
 0x2b3   : > { %1252 = vmatprep.mubr.bf16.mxu1 %v1028_v15  ;;  %1526 = vmatprep.subr.bf16.mxu0 %v3119_v50 }
 0x2b4   : > { %1253 = vmatmul.mubr.bf16.gmra.mxu1 %v1027_v44 }
 0x2b5   : > { %2914 = vmatpush3.bf16.msra.mxu1 %v3123_v34 }
 0x2b6   : > { %1527 = vmatpush1.bf16.msra.mxu0 %v3117_v51  ;;  %2915 = vmatprep.subr.bf16.mxu1 %v3127_v48 }
 0x2b7   : > { %1528 = vmatprep.subr.bf16.mxu0 %v3122_v53 }
 0x2b9   : > { %2916 = vmatpush3.bf16.msra.mxu1 %v3127_v48 }
 0x2ba   : > { %1529 = vmatpush1.bf16.msra.mxu0 %v3120_v54  ;;  %2917 = vmatprep.subr.bf16.mxu1 %v3131_v0 }
 0x2bb   : > { %1530 = vmatprep.subr.bf16.mxu0 %v3126_v55 }
 0x2bd   : > { %2918 = vmatpush3.bf16.msra.mxu1 %v3131_v0 }
 0x2be   : > { %1531 = vmatpush1.bf16.msra.mxu0 %v3124_v56  ;;  %2919 = vmatprep.subr.bf16.mxu1 %v3132_v61 }
 0x2bf   : > { %1532 = vmatprep.subr.bf16.mxu0 %v3130_v59 }
 0x2c1   : > { %2920 = vmatpush3.bf16.msra.mxu1 %v3132_v61 }
 0x2c2   : > { %1533 = vmatpush1.bf16.msra.mxu0 %v3128_v60  ;;  %2921 = vmatprep.subr.bf16.mxu1 %v3133_v62 }
 0x2c5   : > { %2922 = vmatpush3.bf16.msra.mxu1 %v3133_v62 }
 0x2c6   : > { %1832 = vmatprep.subr.bf16.mxu1 %v3136_v25 }
 0x33c   : > { %v2827_v63 = vpop.f32.mrf.mxu1 }
 0x33e   : > { %v2828_v1 = vpop.f32.mrf.mxu1 }
 0x33f   : > { %v2829_v58 = vadd.f32 %v2828_v1, %v2827_v63 }
 0x340   : > { %v2830_v47 = vpop.f32.mrf.mxu1 }
 0x341   : > { %v1199_v5 = vadd.f32 %v2829_v58, %v4017_v4 }
 0x342   : > { %v2831_v49 = vpop.f32.mrf.mxu1 }
 0x343   : > { %v2832_v57 = vadd.f32 %v2831_v49, %v2830_v47 }
 0x344   : > { %v2833_v42 = vpop.f32.mrf.mxu1 }
 0x345   : > { %v1202_v6 = vadd.f32 %v2832_v57, %v4017_v4 }
 0x346   : > { %v2834_v7 = vpop.f32.mrf.mxu1 }
 0x347   : > { %v1261_v3 = vpack.c.bf16 %v1202_v6, %v1199_v5  ;;  %v2835_v10 = vadd.f32 %v2834_v7, %v2833_v42 }
 0x348   : > { %v2836_v9 = vpop.f32.mrf.mxu1 }
 0x349   : > { %v1269_v16 = vmul.bf16 %v1261_v3, %v1261_v3  ;;  %v1207_v11 = vadd.f32 %v2835_v10, %v4017_v4 }
 0x34a   : > { %v2837_v17 = vpop.f32.mrf.mxu1 }
 0x34b   : > { %v1277_v19 = vmul.bf16 %v1269_v16, %v1261_v3  ;;  %v2838_v13 = vadd.f32 %v2837_v17, %v2836_v9 }
 0x34c   : > { %v2839_v24 = vpop.f32.mrf.mxu1 }
 0x34d   : > { %v1285_v27 = vmul.bf16 1027030327, %v1277_v19  ;;  %v1210_v22 = vadd.f32 %v2838_v13, %v4017_v4 }
 0x34e   : > { %v2840_v23 = vpop.f32.mrf.mxu1 }
 0x34f   : > { %v1293_v46 = vadd.bf16 %v1285_v27, %v1261_v3  ;;  %v4023_v8 = vpack.c.bf16 %v1210_v22, %v1207_v11  ;;  %v2841_v43 = vadd.f32 %v2840_v23, %v2839_v24 }
 0x350   : > { %v2842_v12 = vpop.f32.mrf.mxu1 }
 0x351   : > { %v1301_v31 = vmul.bf16 1061961548, %v1293_v46  ;;  %v1270_v26 = vmul.bf16 %v4023_v8, %v4023_v8  ;;  %v1215_v44 = vadd.f32 %v2841_v43, %v4017_v4  ;;  %v3134_v46 = vld [vmem:[#allocation8 + $0x70] ss:$8 sps:$4 sm:$0xff]  }
 0x352   : > { %v2843_v33 = vpop.f32.mrf.mxu1 }
 0x353   : > { %3230 = vtanh.bf16 %v1301_v31  ;;  %v1278_v28 = vmul.bf16 %v1270_v26, %v4023_v8  ;;  %v2844_v32 = vadd.f32 %v2843_v33, %v2842_v12  ;;  %v3139_v26 = vld [vmem:[#allocation8 + $0x64] ss:$8 sps:$4 sm:$0xff]  }
 0x354   : > { %v2845_v15 = vpop.f32.mrf.mxu1 }
 0x355   : > { %v1286_v52 = vmul.bf16 1027030327, %v1278_v28  ;;  %v1218_v21 = vadd.f32 %v2844_v32, %v4017_v4 }
 0x356   : > { %v2846_v37 = vpop.f32.mrf.mxu1 }
 0x357   : > { %v1294_v35 = vadd.bf16 %v1286_v52, %v4023_v8  ;;  %v4031_v20 = vpack.c.bf16 %v1218_v21, %v1215_v44  ;;  %v2847_v18 = vadd.f32 %v2846_v37, %v2845_v15  ;;  %v3137_v15 = vld [vmem:[#allocation8 + $0x60] ss:$8 sps:$4 sm:$0xff]  }
 0x358   : > { %v2848_v2 = vpop.f32.mrf.mxu1 }
 0x359   : > { %v1302_v38 = vmul.bf16 1061961548, %v1294_v35  ;;  %v1271_v41 = vmul.bf16 %v4031_v20, %v4031_v20  ;;  %v1223_v53 = vadd.f32 %v2847_v18, %v4017_v4 }
 0x35a   : > { %v2849_v40 = vpop.f32.mrf.mxu1 }
 0x35b   : > { %3232 = vtanh.bf16 %v1302_v38  ;;  %v1279_v39 = vmul.bf16 %v1271_v41, %v4031_v20  ;;  %v2850_v45 = vadd.f32 %v2849_v40, %v2848_v2 }
 0x35c   : > { %v2851_v50 = vpop.f32.mrf.mxu1 }
 0x35d   : > { %v1287_v51 = vmul.bf16 1027030327, %v1279_v39  ;;  %v1226_v34 = vadd.f32 %v2850_v45, %v4017_v4  ;;  %v3140_v39 = vld [vmem:[#allocation8 + $0x50] ss:$8 sps:$4 sm:$0xff]  }
 0x35e   : > { %v2852_v54 = vpop.f32.mrf.mxu1 }
 0x35f   : > { %v4038_v48 = vpack.c.bf16 %v1226_v34, %v1223_v53  ;;  %v1295_v56 = vadd.bf16 %v1287_v51, %v4031_v20  ;;  %v2853_v61 = vadd.f32 %v2852_v54, %v2851_v50  ;;  %v3145_v54 = vld [vmem:[#allocation8 + $0x44] ss:$8 sps:$4 sm:$0xff]  }
 0x360   : > { %v2854_v59 = vpop.f32.mrf.mxu1 }
 0x361   : > { %v3231_v55 = vpop.eup %3230  ;;  %v1272_v60 = vmul.bf16 %v4038_v48, %v4038_v48  ;;  %v1303_v62 = vmul.bf16 1061961548, %v1295_v56  ;;  %v1231_v42 = vadd.f32 %v2853_v61, %v4017_v4 }
 0x362   : > { %v1317_v0 = vadd.bf16 1065369472, %v3231_v55  ;;  %v2855_v25 = vpop.f32.mrf.mxu1 }
 0x363   : > { %v1280_v1 = vmul.bf16 %v1272_v60, %v4038_v48  ;;  %v2856_v47 = vadd.f32 %v2855_v25, %v2854_v59  ;;  %3234 = vtanh.bf16 %v1303_v62  ;;  %v3143_v60 = vld [vmem:[#allocation8 + $0x40] ss:$8 sps:$4 sm:$0xff]   ;;  %v3148_v62 = vld [vmem:[#allocation8 + $0x34] ss:$8 sps:$4 sm:$0xff]  }
 0x364   : > { %v1325_v63 = vmul.bf16 1056980736, %v1317_v0  ;;  %v2857_v58 = vpop.f32.mrf.mxu1 }
 0x365   : > { %v1288_v57 = vmul.bf16 1027030327, %v1280_v1  ;;  %v1234_v5 = vadd.f32 %v2856_v47, %v4017_v4 }
 0x366   : > { %v1333_v49 = vmul.bf16 %v1325_v63, %v1261_v3  ;;  %v2858_v6 = vpop.f32.mrf.mxu1 }
 0x367   : > { %v4046_v9 = vpack.c.bf16 %v1234_v5, %v1231_v42  ;;  %v1296_v16 = vadd.bf16 %v1288_v57, %v4038_v48  ;;  %v2859_v19 = vadd.f32 %v2858_v6, %v2857_v58  ;;  %v3146_v42 = vld [vmem:[#allocation8 + $0x30] ss:$8 sps:$4 sm:$0xff]  }
 0x368   : > { %1551 = vmatmul.mubr.bf16.vlgmr.msra.gmra.mxu0 %v1333_v49  ;;  %2923 = vmatprep.mubr.bf16.mxu1 %v1333_v49  ;;  %v2860_v10 = vpop.f32.mrf.mxu1 }
 0x369   : > { %v3233_v7 = vpop.eup %3232  ;;  %1560 = vmatprep.mubr.bf16.mxu0 %v3538_v36  ;;  %v1273_v3 = vmul.bf16 %v4046_v9, %v4046_v9  ;;  %v1304_v13 = vmul.bf16 1061961548, %v1296_v16  ;;  %v1239_v28 = vadd.f32 %v2859_v19, %v4017_v4 }
 0x36a   : > { %v1318_v17 = vadd.bf16 1065369472, %v3233_v7  ;;  %v2861_v27 = vpop.f32.mrf.mxu1 }
 0x36b   : > { %v1281_v22 = vmul.bf16 %v1273_v3, %v4046_v9  ;;  %v2862_v24 = vadd.f32 %v2861_v27, %v2860_v10  ;;  %3236 = vtanh.bf16 %v1304_v13  ;;  %v3151_v10 = vld [vmem:[#allocation8 + $0x24] ss:$8 sps:$4 sm:$0xff]   ;;  %v3149_v13 = vld [vmem:[#allocation8 + $0x20] ss:$8 sps:$4 sm:$0xff]   ;;  %v3154_v27 = vld [vmem:[#allocation8 + $0x14] ss:$8 sps:$4 sm:$0xff]  }
 0x36c   : > { %v1326_v11 = vmul.bf16 1056980736, %v1318_v17  ;;  %v2863_v23 = vpop.f32.mrf.mxu1 }
 0x36d   : > { %v1289_v12 = vmul.bf16 1027030327, %v1281_v22  ;;  %v1242_v43 = vadd.f32 %v2862_v24, %v4017_v4 }
 0x36e   : > { %v1334_v31 = vmul.bf16 %v1326_v11, %v4023_v8  ;;  %v2864_v33 = vpop.f32.mrf.mxu1  ;;  %v3142_v8 = vld [vmem:[#allocation8 + $0x54] ss:$8 sps:$4 sm:$0xff]  }
 0x36f   : > { %v4056_v52 = vpack.c.bf16 %v1242_v43, %v1239_v28  ;;  %v1297_v32 = vadd.bf16 %v1289_v12, %v4046_v9  ;;  %v2865_v37 = vadd.f32 %v2864_v33, %v2863_v23  ;;  %v3155_v43 = vld [vmem:[#allocation8] ss:$8 sps:$4 sm:$0xff]  }
 0x370   : > { %1561 = vmatmul.mubr.bf16.gmra.mxu0 %v1334_v31  ;;  %2924 = vmatmul.mubr.bf16.vlgmr.msra.gmra.mxu1 %v1334_v31  ;;  %v2866_v44 = vpop.f32.mrf.mxu1 }
 0x371   : > { %1570 = vmatprep.mubr.bf16.mxu0 %v3538_v36  ;;  %1833 = vmatpush1.bf16.msra.mxu1 %v3134_v46  ;;  %v3235_v21 = vpop.eup %3234  ;;  %v1274_v35 = vmul.bf16 %v4056_v52, %v4056_v52  ;;  %v1305_v38 = vmul.bf16 1061961548, %v1297_v32  ;;  %v1247_v53 = vadd.f32 %v2865_v37, %v4017_v4 }
 0x372   : > { %1834 = vmatprep.subr.bf16.mxu1 %v3139_v26  ;;  %v2867_v2 = vpop.f32.mrf.mxu1  ;;  %v1319_v41 = vadd.bf16 1065369472, %v3235_v21  ;;  %v3157_v26 = vld [vmem:[#allocation8 + $0x4] ss:$8 sps:$4 sm:$0xff]  }
 0x373   : > { %v1282_v18 = vmul.bf16 %v1274_v35, %v4056_v52  ;;  %v2868_v40 = vadd.f32 %v2867_v2, %v2866_v44  ;;  %3238 = vtanh.bf16 %v1305_v38 }
 0x374   : > { %v2869_v45 = vpop.f32.mrf.mxu1  ;;  %v1327_v50 = vmul.bf16 1056980736, %v1319_v41 }
 0x375   : > { %1835 = vmatpush1.bf16.msra.mxu1 %v3137_v15  ;;  %v1290_v51 = vmul.bf16 1027030327, %v1282_v18  ;;  %v1250_v34 = vadd.f32 %v2868_v40, %v4017_v4  ;;  %v4086_v18 = vld [vmem:[%s3721_s26] sm:$0xff]  ;;  %v4089_v40 = vld [vmem:[%s3721_s26 + $0x8] sm:$0xff] }
 0x376   : > { %1836 = vmatprep.subr.bf16.mxu1 %v3142_v8  ;;  %v2870_v55 = vpop.f32.mrf.mxu1  ;;  %v1335_v56 = vmul.bf16 %v1327_v50, %v4031_v20  ;;  %4578 = vst [vmem:[#allocation15_spill] sm:$0xff] %v4089_v40  ;;  %v4098_v50 = vld [vmem:[%s3721_s26 + $0x18] sm:$0xff] }
 0x377   : > { %v4066_v59 = vpack.c.bf16 %v1250_v34, %v1247_v53  ;;  %v1298_v0 = vadd.bf16 %v1290_v51, %v4056_v52  ;;  %v2871_v1 = vadd.f32 %v2870_v55, %v2869_v45  ;;  %v4095_v45 = vld [vmem:[%s3721_s26 + $0x10] sm:$0xff]  ;;  %v4104_v53 = vld [vmem:[%s3721_s26 + $0x20] sm:$0xff]  ;;  %v4107_v34 = vld [vmem:[%s3721_s26 + $0x28] sm:$0xff] }
 0x378   : > { %v2872_v61 = vpop.f32.mrf.mxu1  ;;  %1571 = vmatmul.mubr.bf16.gmra.mxu0 %v1335_v56  ;;  %2927 = vmatprep.mubr.bf16.mxu1 %v1335_v56  ;;  %v1729_v51 = vpack.c.bf16 %v4098_v50, %v4095_v45  ;;  %v4113_v55 = vld [vmem:[%s3721_s26 + $0x30] sm:$0xff]  ;;  %v4116_v56 = vld [vmem:[%s3721_s26 + $0x38] sm:$0xff] }
 0x379   : > { %1837 = vmatpush1.bf16.msra.mxu1 %v3140_v39  ;;  %v3237_v25 = vpop.eup %3236  ;;  %v1275_v63 = vmul.bf16 %v4066_v59, %v4066_v59  ;;  %1580 = vmatprep.mubr.bf16.mxu0 %v3538_v36  ;;  %v1306_v47 = vmul.bf16 1061961548, %v1298_v0  ;;  %v1255_v7 = vadd.f32 %v2871_v1, %v4017_v4  ;;  %v1728_v39 = vpack.c.bf16 %v4089_v40, %v4086_v18  ;;  %v4122_v0 = vld [vmem:[%s3721_s26 + $0x40] sm:$0xff] }
 0x37a   : > { %1838 = vmatprep.subr.bf16.mxu1 %v3145_v54  ;;  %v2873_v20 = vpop.f32.mrf.mxu1  ;;  %v1320_v58 = vadd.bf16 1065369472, %v3237_v25  ;;  %v1730_v54 = vpack.c.bf16 %v4107_v34, %v4104_v53  ;;  %v4134_v25 = vld [vmem:[%s3721_s26 + $0x58] sm:$0xff]  ;;  %v4140_v1 = vld [vmem:[%s3721_s26 + $0x60] sm:$0xff] }
 0x37b   : > { %v1283_v49 = vmul.bf16 %v1275_v63, %v4066_v59  ;;  %v2874_v57 = vadd.f32 %v2873_v20, %v2872_v61  ;;  %3240 = vtanh.bf16 %v1306_v47  ;;  %v4143_v47 = vld [vmem:[%s3721_s26 + $0x68] sm:$0xff] }
 0x37c   : > { %v1328_v5 = vmul.bf16 1056980736, %v1320_v58  ;;  %v1734_v20 = vpack.c.bf16 %v4143_v47, %v4140_v1  ;;  %v4149_v58 = vld [vmem:[%s3721_s26 + $0x70] sm:$0xff] }
 0x37d   : > { %1839 = vmatpush1.bf16.msra.mxu1 %v3143_v60  ;;  %v1291_v6 = vmul.bf16 1027030327, %v1283_v49  ;;  %v1258_v16 = vadd.f32 %v2874_v57, %v4017_v4  ;;  %v3152_v4 = vld [vmem:[#allocation8 + $0x10] ss:$8 sps:$4 sm:$0xff]   ;;  %v4125_v60 = vld [vmem:[%s3721_s26 + $0x48] sm:$0xff] }
 0x37e   : > { %1840 = vmatprep.subr.bf16.mxu1 %v3148_v62  ;;  %v1336_v17 = vmul.bf16 %v1328_v5, %v4038_v48  ;;  %v1732_v61 = vpack.c.bf16 %v4125_v60, %v4122_v0  ;;  %v4131_v62 = vld [vmem:[%s3721_s26 + $0x50] sm:$0xff]  ;;  %v4152_v49 = vld [vmem:[%s3721_s26 + $0x78] sm:$0xff] }
 0x37f   : > { %v1268_v3 = vpack.c.bf16 %v1258_v16, %v1255_v7  ;;  %v1299_v19 = vadd.bf16 %v1291_v6, %v4066_v59  ;;  %v1733_v63 = vpack.c.bf16 %v4134_v25, %v4131_v62  ;;  %v1735_v57 = vpack.c.bf16 %v4152_v49, %v4149_v58  ;;  %v3159_v5 = vld [vmem:[%s4560_s9 + $0x30] sm:$0xff]   ;;  %v3161_v6 = vld [vmem:[%s4560_s9 + $0x20] sm:$0xff]   ;;  %v3162_v7 = vld [vmem:[%s4560_s9 + $0x18] sm:$0xff]  }
 0x380   : > { %1581 = vmatmul.mubr.bf16.gmra.mxu0 %v1336_v17  ;;  %2928 = vmatmul.mubr.bf16.gmra.mxu1 %v1336_v17  ;;  %v3163_v16 = vld [vmem:[%s4560_s9 + $0x10] sm:$0xff]   ;;  %v3165_v17 = vld [vmem:[%s4560_s9] sm:$0xff]  }
 0x381   : > { %1841 = vmatpush1.bf16.msra.mxu1 %v3146_v42  ;;  %v3239_v11 = vpop.eup %3238  ;;  %v1276_v22 = vmul.bf16 %v1268_v3, %v1268_v3  ;;  %1590 = vmatprep.mubr.bf16.mxu0 %v3538_v36  ;;  %v1307_v24 = vmul.bf16 1061961548, %v1299_v19  ;;  %v3158_v42 = vld [vmem:[%s4560_s9 + $0x38] sm:$0xff]  }
 0x382   : > { %1842 = vmatprep.subr.bf16.mxu1 %v3151_v10  ;;  %v1321_v46 = vadd.bf16 1065369472, %v3239_v11  ;;  %2939 = vmatprep.subr.bf16.mxu0 %v3158_v42  ;;  %v3164_v10 = vld [vmem:[%s4560_s9 + $0x8] sm:$0xff]  }
 0x383   : > { %v1284_v23 = vmul.bf16 %v1276_v22, %v1268_v3  ;;  %3242 = vtanh.bf16 %v1307_v24  ;;  %2940 = vmatpush3.bf16.msra.mxu0 %v3158_v42  ;;  %v2439_v42 = vld [vmem:[%s4221_s21 + $0x28] sm:$0xff] }
 0x384   : > { %v1329_v48 = vmul.bf16 1056980736, %v1321_v46  ;;  %2941 = vmatprep.subr.bf16.mxu0 %v3159_v5 }
 0x385   : > { %1843 = vmatpush1.bf16.msra.mxu1 %v3149_v13  ;;  %v1292_v31 = vmul.bf16 1027030327, %v1284_v23 }
 0x386   : > { %1844 = vmatprep.subr.bf16.mxu1 %v3154_v27  ;;  %v1337_v12 = vmul.bf16 %v1329_v48, %v4046_v9 }
 0x387   : > { %v1300_v28 = vadd.bf16 %v1292_v31, %v1268_v3  ;;  %2942 = vmatpush3.bf16.msra.mxu0 %v3159_v5  ;;  %v4253_v5 = vld [vmem:[%s4558_s7] sm:$0x7] }
 0x388   : > { %1591 = vmatmul.mubr.bf16.gmra.mxu0 %v1337_v12  ;;  %2931 = vmatprep.mubr.bf16.mxu1 %v1337_v12 }
 0x389   : > { %1845 = vmatpush1.bf16.msra.mxu1 %v3152_v4  ;;  %v3241_v33 = vpop.eup %3240  ;;  %1600 = vmatprep.mubr.bf16.mxu0 %v3538_v36  ;;  %v1308_v32 = vmul.bf16 1061961548, %v1300_v28 }
 0x38a   : > { %1846 = vmatprep.subr.bf16.mxu1 %v3157_v26  ;;  %v1322_v15 = vadd.bf16 1065369472, %v3241_v33 }
 0x38b   : > { %3244 = vtanh.bf16 %v1308_v32 }
 0x38c   : > { %v1330_v44 = vmul.bf16 1056980736, %v1322_v15 }
 0x38d   : > { %1847 = vmatpush1.bf16.msra.mxu1 %v3155_v43 }
 0x38e   : > { %v1338_v8 = vmul.bf16 %v1330_v44, %v4056_v52 }
 0x390   : > { %1601 = vmatmul.mubr.bf16.gmra.mxu0 %v1338_v8  ;;  %2932 = vmatmul.mubr.bf16.gmra.mxu1 %v1338_v8 }
 0x391   : > { %v3243_v9 = vpop.eup %3242  ;;  %1610 = vmatprep.mubr.bf16.mxu0 %v3538_v36 }
 0x392   : > { %v1323_v21 = vadd.bf16 1065369472, %v3243_v9  ;;  %v2435_v9 = vld [vmem:[%s4221_s21 + $0x8] sm:$0xff] }
 0x393   : > { %2457 = vperm.xlu1 %3061, %v2435_v9   ;;  %v4271_v9 = vrot.slane %v4253_v5, %v668_v30 }
 0x394   : > { %v1331_v35 = vmul.bf16 1056980736, %v1323_v21 }
 0x396   : > { %v1339_v37 = vmul.bf16 %v1331_v35, %v4066_v59  ;;  %v1731_v59 = vpack.c.bf16 %v4116_v56, %v4113_v55  ;;  %v2436_v35 = vld [vmem:[%s4221_s21 + $0x10] sm:$0xff] }
 0x397   : > { %2462 = vperm.xlu1 %3061, %v2436_v35  }
 0x398   : > { %1611 = vmatmul.mubr.bf16.gmra.mxu0 %v1339_v37  ;;  %2935 = vmatprep.mubr.bf16.mxu1 %v1339_v37  ;;  %v2434_v37 = vld [vmem:[%s4221_s21] sm:$0xff] }
 0x399   : > { %v3245_v38 = vpop.eup %3244  ;;  %1620 = vmatprep.mubr.bf16.mxu0 %v3538_v36  ;;  %2452 = vperm.xlu0 %3060, %v2434_v37  }
 0x39a   : > { %v1324_v2 = vadd.bf16 1065369472, %v3245_v38 }
 0x39c   : > { %v1332_v52 = vmul.bf16 1056980736, %v1324_v2  ;;  %v2443_v2 = vld [vmem:[%s4221_s21 + $0x48] sm:$0xff] }
 0x39d   : > { %2497 = vperm.xlu0 %3060, %v2443_v2  }
 0x39e   : > { %v1340_v41 = vmul.bf16 %v1332_v52, %v1268_v3 }
 0x3a0   : > { %1621 = vmatmul.mubr.bf16.gmra.mxu0 %v1340_v41  ;;  %2936 = vmatmul.mubr.bf16.gmra.mxu1 %v1340_v41  ;;  %v2437_v41 = vld [vmem:[%s4221_s21 + $0x18] sm:$0xff] }
 0x3a1   : > { %1864 = vmatprep.mubr.bf16.mxu1 %v3538_v36  ;;  %2467 = vperm.xlu1 %3061, %v2437_v41   ;;  %v2441_v41 = vld [vmem:[%s4221_s21 + $0x38] sm:$0xff] }
 0x3a8   : > { %1865 = vmatmul.mubr.bf16.vlgmr.msra.gmra.mxu1 %v1728_v39 }
 0x3a9   : > { %1874 = vmatprep.mubr.bf16.mxu1 %v3538_v36 }
 0x3b0   : > { %1875 = vmatmul.mubr.bf16.gmra.mxu1 %v1729_v51  ;;  %v2445_v51 = vld [vmem:[%s4221_s21 + $0x58] sm:$0xff] }
 0x3b1   : > { %1884 = vmatprep.mubr.bf16.mxu1 %v3538_v36  ;;  %2507 = vperm.xlu0 %3060, %v2445_v51  }
 0x3b8   : > { %1885 = vmatmul.mubr.bf16.gmra.mxu1 %v1730_v54 }
 0x3b9   : > { %1894 = vmatprep.mubr.bf16.mxu1 %v3538_v36 }
 0x3c0   : > { %1895 = vmatmul.mubr.bf16.gmra.mxu1 %v1731_v59  ;;  %v2438_v59 = vld [vmem:[%s4221_s21 + $0x20] sm:$0xff] }
 0x3c1   : > { %1904 = vmatprep.mubr.bf16.mxu1 %v3538_v36  ;;  %2472 = vperm.xlu1 %3061, %v2438_v59  }
 0x3c5   : > { %2477 = vperm.xlu1 %3061, %v2439_v42  }
 0x3c8   : > { %1905 = vmatmul.mubr.bf16.gmra.mxu1 %v1732_v61 }
 0x3c9   : > { %1914 = vmatprep.mubr.bf16.mxu1 %v3538_v36 }
 0x3d0   : > { %1915 = vmatmul.mubr.bf16.gmra.mxu1 %v1733_v63 }
 0x3d1   : > { %1924 = vmatprep.mubr.bf16.mxu1 %v3538_v36 }
 0x3d8   : > { %1925 = vmatmul.mubr.bf16.gmra.mxu1 %v1734_v20  ;;  %v2447_v20 = vld [vmem:[%s4221_s21 + $0x68] sm:$0xff] }
 0x3d9   : > { %1934 = vmatprep.mubr.bf16.mxu1 %v3538_v36  ;;  %v3160_v36 = vld [vmem:[%s4560_s9 + $0x28] sm:$0xff]   ;;  %2517 = vperm.xlu0 %3060, %v2447_v20  }
 0x3da   : > { %2943 = vmatprep.subr.bf16.mxu0 %v3160_v36 }
 0x3db   : > { %2944 = vmatpush3.bf16.msra.mxu0 %v3160_v36 }
 0x3dc   : > { %2945 = vmatprep.subr.bf16.mxu0 %v3161_v6 }
 0x3df   : > { %2946 = vmatpush3.bf16.msra.mxu0 %v3161_v6 }
 0x3e0   : > { %1935 = vmatmul.mubr.bf16.gmra.mxu1 %v1735_v57  ;;  %2947 = vmatprep.subr.bf16.mxu0 %v3162_v7 }
 0x3e3   : > { %2948 = vmatpush3.bf16.msra.mxu0 %v3162_v7  ;;  %v4262_v7 = vrot.slane %v4253_v5, %v672_v14 }
 0x3e4   : > { %2949 = vmatprep.subr.bf16.mxu0 %v3163_v16 }
 0x3e7   : > { %2950 = vmatpush3.bf16.msra.mxu0 %v3163_v16  ;;  %v2449_v16 = vld [vmem:[%s4221_s21 + $0x78] sm:$0xff] }
 0x3e8   : > { %2951 = vmatprep.subr.bf16.mxu0 %v3164_v10  ;;  %2527 = vperm.xlu0 %3060, %v2449_v16  }
 0x3eb   : > { %2952 = vmatpush3.bf16.msra.mxu0 %v3164_v10 }
 0x3ec   : > { %2953 = vmatprep.subr.bf16.mxu0 %v3165_v17 }
 0x3ef   : > { %2954 = vmatpush3.bf16.msra.mxu0 %v3165_v17  ;;  %v2440_v17 = vld [vmem:[%s4221_s21 + $0x30] sm:$0xff] }
 0x3f0   : > { %2482 = vperm.xlu1 %3061, %v2440_v17   ;;  %v2442_v17 = vld [vmem:[%s4221_s21 + $0x40] sm:$0xff] }
 0x3f4   : > { %2487 = vperm.xlu1 %3061, %v2441_v41  }
 0x3f8   : > { %2492 = vperm.xlu1 %3061, %v2442_v17  }
 0x428   : > { %v4180_v3 = vpop.f32.mrf.mxu0 }
 0x429   : > { %v1553_v51 = vadd.f32 %v4180_v3, %v4271_v9 }
 0x42a   : > { %v1554_v19 = vpop.f32.mrf.mxu0 }
 0x42b   : > { %v1555_v2 = vadd.f32 %v1554_v19, %v4262_v7 }
 0x42c   : > { %v1556_v13 = vpop.f32.mrf.mxu0 }
 0x42d   : > { %v1557_v59 = vadd.f32 %v1556_v13, %v4271_v9 }
 0x42e   : > { %v4182_v27 = vpop.f32.mrf.mxu0 }
 0x430   : > { %v4184_v11 = vpop.f32.mrf.mxu1  ;;  %v4186_v22 = vpop.f32.mrf.mxu0 }
 0x431   : > { %v1563_v41 = vadd.f32 %v4186_v22, %v4271_v9 }
 0x432   : > { %v4188_v24 = vpop.f32.mrf.mxu1  ;;  %v4190_v46 = vpop.f32.mrf.mxu0 }
 0x434   : > { %v4192_v23 = vpop.f32.mrf.mxu1  ;;  %v4194_v4 = vpop.f32.mrf.mxu0 }
 0x436   : > { %v4196_v48 = vpop.f32.mrf.mxu1  ;;  %v4198_v31 = vpop.f32.mrf.mxu0 }
 0x438   : > { %v4202_v12 = vpop.f32.mrf.mxu0 }
 0x43a   : > { %v4206_v43 = vpop.f32.mrf.mxu0 }
 0x43c   : > { %v4210_v32 = vpop.f32.mrf.mxu0 }
 0x43e   : > { %v4223_v8 = vpop.f32.mrf.mxu0 }
 0x440   : > { %v4200_v26 = vpop.f32.mrf.mxu1  ;;  %v4230_v38 = vpop.f32.mrf.mxu0 }
 0x442   : > { %v4204_v28 = vpop.f32.mrf.mxu1  ;;  %v4236_v39 = vpop.f32.mrf.mxu0 }
 0x444   : > { %v4208_v33 = vpop.f32.mrf.mxu1  ;;  %v4242_v61 = vpop.f32.mrf.mxu0 }
 0x446   : > { %v4212_v15 = vpop.f32.mrf.mxu1  ;;  %v4255_v36 = vpop.f32.mrf.mxu0 }
 0x448   : > { %v4273_v35 = vpop.f32.mrf.mxu0 }
 0x44a   : > { %v4282_v42 = vpop.f32.mrf.mxu0 }
 0x44c   : > { %v4289_v3 = vpop.f32.mrf.mxu0 }
 0x450   : > { %v4214_v44 = vpop.f32.mrf.mxu1 }
 0x451   : > { %4579 = vst [vmem:[#allocation16_spill] sm:$0xff] %v4214_v44 }
 0x452   : > { %v4226_v21 = vpop.f32.mrf.mxu1 }
 0x453   : > { %4580 = vst [vmem:[#allocation17_spill] sm:$0xff] %v4226_v21 }
 0x454   : > { %v4233_v52 = vpop.f32.mrf.mxu1 }
 0x455   : > { %4581 = vst [vmem:[#allocation18_spill] sm:$0xff] %v4233_v52 }
 0x456   : > { %v4239_v54 = vpop.f32.mrf.mxu1 }
 0x457   : > { %4582 = vst [vmem:[#allocation19_spill] sm:$0xff] %v4239_v54 }
 0x460   : > { %v4244_v63 = vpop.f32.mrf.mxu1 }
 0x461   : > { %4583 = vst [vmem:[#allocation20_spill] sm:$0xff] %v4244_v63 }
 0x462   : > { %v4247_v57 = vpop.f32.mrf.mxu1 }
 0x463   : > { %4584 = vst [vmem:[#allocation21_spill] sm:$0xff] %v4247_v57 }
 0x464   : > { %v4257_v6 = vpop.f32.mrf.mxu1 }
 0x465   : > { %4585 = vst [vmem:[#allocation22_spill] sm:$0xff] %v4257_v6 }
 0x466   : > { %v4265_v10 = vpop.f32.mrf.mxu1 }
 0x467   : > { %4586 = vst [vmem:[#allocation23_spill] sm:$0xff] %v4265_v10  ;;  %v1559_v10 = vadd.f32 %v4182_v27, %v4262_v7 }
 0x468   : > { %v1866_v37 = vpop.f32.mrf.mxu1 }
 0x469   : > { %v1945_v16 = vadd.f32 %v1866_v37, %v1553_v51  ;;  %v2444_v37 = vld [vmem:[%s4221_s21 + $0x50] sm:$0xff]  ;;  %v4302_v51 = vpop.f32.mrf.mxu0 }
 0x46a   : > { %v1868_v14 = vpop.f32.mrf.mxu1  ;;  %2502 = vperm.xlu1 %3061, %v2444_v37   ;;  %v1573_v37 = vadd.f32 %v4202_v12, %v4271_v9 }
 0x46b   : > { %v4280_v20 = vadd.f32 %v1868_v14, %v1555_v2  ;;  %v1565_v2 = vadd.f32 %v4190_v46, %v4262_v7  ;;  %v4309_v54 = vpop.f32.mrf.mxu0 }
 0x46c   : > { %v1870_v30 = vpop.f32.mrf.mxu1 }
 0x46d   : > { %v1946_v57 = vadd.f32 %v1870_v30, %v1557_v59 }
 0x46e   : > { %v1872_v19 = vpop.f32.mrf.mxu1 }
 0x46f   : > { %v1961_v6 = vpack.c.bf16 %v1946_v57, %v1945_v16  ;;  %v4287_v63 = vadd.f32 %v1872_v19, %v1559_v10  ;;  %v1567_v57 = vadd.f32 %v4194_v4, %v4271_v9  ;;  %v2446_v19 = vld [vmem:[%s4221_s21 + $0x60] sm:$0xff] }
 0x470   : > { %v1876_v13 = vpop.f32.mrf.mxu1  ;;  %2512 = vperm.xlu1 %3061, %v2446_v19  }
 0x471   : > { %v2781_v14 = vmul.bf16 3216621497, %v1961_v6  ;;  %v1569_v6 = vadd.f32 %v4198_v31, %v4262_v7  ;;  %v1947_v59 = vadd.f32 %v1876_v13, %v1563_v41  ;;  %v2448_v13 = vld [vmem:[%s4221_s21 + $0x70] sm:$0xff]  ;;  %v1577_v41 = vadd.f32 %v4210_v32, %v4271_v9  ;;  %s3539_s21 = smov [#allocation10]  }
 0x472   : > { %v1878_v27 = vpop.f32.mrf.mxu1  ;;  %v1585_v32 = vadd.f32 %v4236_v39, %v4262_v7  ;;  %v1589_v39 = vadd.f32 %v4255_v36, %v4262_v7  ;;  %v1593_v36 = vadd.f32 %v4273_v35, %v4271_v9  ;;  %s3458_s25 = sshll.u32 %s3539_s21, 4  ;;  %s3459_s25 = int_to_ptr.vmem [resolvable:$false] %s3458_s25 }
 0x473   : > { %3246 = vpow.bf16 %v2781_v14  ;;  %v4300_v10 = vadd.f32 %v1878_v27, %v1565_v2  ;;  %v1575_v2 = vadd.f32 %v4206_v43, %v4262_v7  ;;  %v1579_v43 = vadd.f32 %v4223_v8, %v4262_v7  ;;  %s3460_s28 = scalar_lea.vmem %s3459_s25, 4096  ;;  %p3461_p6 = scmp.lt.s32.totalorder %s4503_s30, %s3459_s25 }
 0x474   : > { %v1880_v46 = vpop.f32.mrf.mxu1  ;;  %2522 = vperm.xlu1 %3061, %v2448_v13   ;;  %v1583_v8 = vadd.f32 %v4230_v38, %v4271_v9  ;;  %p3462_p9 = scmp.lt.s32.totalorder %s3460_s28, %s3454_s18 }
 0x475   : > { %v1948_v30 = vadd.f32 %v1880_v46, %v1567_v57  ;;  %v1604_v46 = vpop.f32.mrf.mxu0 }
 0x476   : > { %v1882_v16 = vpop.f32.mrf.mxu1  ;;  %p3463_p7 = por %p3462_p9, %p3461_p6 }
 0x477   : > { %v1962_v17 = vpack.c.bf16 %v1948_v30, %v1947_v59  ;;  %v4307_v22 = vadd.f32 %v1882_v16, %v1569_v6  ;;  %v1606_v27 = vpop.f32.mrf.mxu0 }
 0x478   : > { %v1886_v4 = vpop.f32.mrf.mxu1  ;;  %p3464_p13 = pnand %p3463_p7, %p3457_p4 }
 0x479   : > { %v2782_v14 = vmul.bf16 3216621497, %v1962_v17  ;;  %v1949_v59 = vadd.f32 %v1886_v4, %v1573_v37  ;;  %v1587_v4 = vadd.f32 %v4242_v61, %v4271_v9  ;;  %v1608_v37 = vpop.f32.mrf.mxu0  ;;  %v1595_v61 = vadd.f32 %v4282_v42, %v4262_v7 }
 0x47a   : > { %v1888_v31 = vpop.f32.mrf.mxu1  ;;  %v1599_v42 = vadd.f32 %v4302_v51, %v4262_v7 }
 0x47b   : > { %3248 = vpow.bf16 %v2782_v14  ;;  %v4320_v57 = vadd.f32 %v1888_v31, %v1575_v2 }
 0x47c   : > { %v1890_v6 = vpop.f32.mrf.mxu1 }
 0x47d   : > { %v1950_v30 = vadd.f32 %v1890_v6, %v1577_v41 }
 0x47e   : > { %v1892_v16 = vpop.f32.mrf.mxu1 }
 0x47f   : > { %v1963_v19 = vpack.c.bf16 %v1950_v30, %v1949_v59  ;;  %v4324_v17 = vadd.f32 %v1892_v16, %v1579_v43  ;;  %v1612_v16 = vpop.f32.mrf.mxu0 }
 0x480   : > { %v1896_v12 = vpop.f32.mrf.mxu1 }
 0x481   : > { %v3247_v21 = vpop.eup %3246  ;;  %v2783_v2 = vmul.bf16 3216621497, %v1963_v19  ;;  %v1951_v6 = vadd.f32 %v1896_v12, %v1583_v8  ;;  %v1597_v12 = vadd.f32 %v4289_v3, %v4271_v9  ;;  %v1605_v3 = vadd.f32 %v1604_v46, %v4262_v7 }
 0x482   : > { %v2001_v31 = vadd.bf16 1065369472, %v3247_v21  ;;  %v1898_v52 = vpop.f32.mrf.mxu1 }
 0x483   : > { %3250 = vpow.bf16 %v2783_v2  ;;  %v4334_v13 = vadd.f32 %v1898_v52, %v1585_v32 }
 0x484   : > { %3252 = vrcp.bf16 %v2001_v31  ;;  %v1900_v41 = vpop.f32.mrf.mxu1 }
 0x485   : > { %v1952_v43 = vadd.f32 %v1900_v41, %v1587_v4  ;;  %v1614_v4 = vpop.f32.mrf.mxu0 }
 0x486   : > { %v1902_v59 = vpop.f32.mrf.mxu1 }
 0x487   : > { %v1964_v21 = vpack.c.bf16 %v1952_v43, %v1951_v6  ;;  %v4338_v30 = vadd.f32 %v1902_v59, %v1589_v39 }
 0x488   : > { %v1906_v38 = vpop.f32.mrf.mxu1 }
 0x489   : > { %v3249_v19 = vpop.eup %3248  ;;  %v2784_v52 = vmul.bf16 3216621497, %v1964_v21  ;;  %v1953_v39 = vadd.f32 %v1906_v38, %v1593_v36  ;;  %v1607_v36 = vadd.f32 %v1606_v27, %v4271_v9 }
 0x48a   : > { %v2002_v2 = vadd.bf16 1065369472, %v3249_v19  ;;  %v1908_v31 = vpop.f32.mrf.mxu1  ;;  %v1616_v19 = vpop.f32.mrf.mxu0 }
 0x48b   : > { %3254 = vpow.bf16 %v2784_v52  ;;  %v4348_v8 = vadd.f32 %v1908_v31, %v1595_v61  ;;  %v1603_v31 = vadd.f32 %v4309_v54, %v4271_v9 }
 0x48c   : > { %3256 = vrcp.bf16 %v2002_v2  ;;  %v1910_v41 = vpop.f32.mrf.mxu1 }
 0x48d   : > { %v1954_v6 = vadd.f32 %v1910_v41, %v1597_v12 }
 0x48e   : > { %v1912_v43 = vpop.f32.mrf.mxu1 }
 0x48f   : > { %v1965_v59 = vpack.c.bf16 %v1954_v6, %v1953_v39  ;;  %v4352_v21 = vadd.f32 %v1912_v43, %v1599_v42  ;;  %v1609_v42 = vadd.f32 %v1608_v37, %v4262_v7  ;;  %v1618_v39 = vpop.f32.mrf.mxu0  ;;  %v1615_v37 = vadd.f32 %v1614_v4, %v4262_v7 }
 0x490   : > { %v1916_v35 = vpop.f32.mrf.mxu1 }
 0x491   : > { %v3251_v14 = vpop.eup %3250  ;;  %v2785_v52 = vmul.bf16 3216621497, %v1965_v59  ;;  %v1955_v6 = vadd.f32 %v1916_v35, %v1603_v31 }
 0x492   : > { %v3253_v2 = vpop.eup %3252  ;;  %v2003_v51 = vadd.bf16 1065369472, %v3251_v14  ;;  %v1918_v38 = vpop.f32.mrf.mxu1 }
 0x493   : > { %3258 = vpow.bf16 %v2785_v52  ;;  %v4360_v12 = vadd.f32 %v1918_v38, %v1605_v3  ;;  %v2010_v41 = vmul.bf16 1065369472, %v3253_v2  ;;  %v1622_v3 = vpop.f32.mrf.mxu0 }
 0x494   : > { %3260 = vrcp.bf16 %v2003_v51  ;;  %v1920_v46 = vpop.f32.mrf.mxu1 }
 0x495   : > { %v1956_v43 = vadd.f32 %v1920_v46, %v1607_v36  ;;  %v2121_v59 = vunpack.c.l.bf16 %v2010_v41  ;;  %v2122_v61 = vunpack.c.h.bf16 %v2010_v41  ;;  %v1613_v36 = vadd.f32 %v1612_v16, %v4271_v9  ;;  %v1624_v4 = vpop.f32.mrf.mxu0 }
 0x496   : > { %v1922_v32 = vpop.f32.mrf.mxu1 }
 0x497   : > { %v1966_v44 = vpack.c.bf16 %v1956_v43, %v1955_v6  ;;  %v4363_v54 = vadd.f32 %v1922_v32, %v1609_v42  ;;  %v2137_v14 = vmul.f32 %v4086_v18, %v2121_v59  ;;  %v2138_v27 = vmul.f32 %v4089_v40, %v2122_v61 }
 0x498   : > { %v1926_v52 = vpop.f32.mrf.mxu1  ;;  %v1617_v42 = vadd.f32 %v1616_v19, %v4271_v9  ;;  %v1619_v6 = vadd.f32 %v1618_v39, %v4262_v7  ;;  %v1625_v39 = vadd.f32 %v1624_v4, %v4262_v7 }
 0x499   : > { %v3255_v2 = vpop.eup %3254  ;;  %v2786_v38 = vmul.bf16 3216621497, %v1966_v44  ;;  %v2153_v31 = vpack.c.bf16 %v2138_v27, %v2137_v14  ;;  %v1957_v14 = vadd.f32 %v1926_v52, %v1613_v36  ;;  %v1623_v36 = vadd.f32 %v1622_v3, %v4271_v9 }
 0x49a   : > { %v3257_v51 = vpop.eup %3256  ;;  %v2004_v41 = vadd.bf16 1065369472, %v3255_v2  ;;  %v1928_v32 = vpop.f32.mrf.mxu1 }
 0x49b   : > { %v2012_v46 = vmul.bf16 1065369472, %v3257_v51  ;;  %3262 = vpow.bf16 %v2786_v38  ;;  %v4372_v61 = vadd.f32 %v1928_v32, %v1615_v37  ;;  %2955 = vmatprep.mubr.bf16.mxu0 %v2153_v31  ;;  %v1626_v37 = vpop.f32.mrf.mxu0 }
 0x49c   : > { %3264 = vrcp.bf16 %v2004_v41  ;;  %v1930_v44 = vpop.f32.mrf.mxu1 }
 0x49d   : > { %v2123_v43 = vunpack.c.l.bf16 %v2012_v46  ;;  %v2124_v59 = vunpack.c.h.bf16 %v2012_v46  ;;  %v1958_v27 = vadd.f32 %v1930_v44, %v1617_v42 }
 0x49e   : > { %v1932_v35 = vpop.f32.mrf.mxu1 }
 0x49f   : > { %v1967_v16 = vpack.c.bf16 %v1958_v27, %v1957_v14  ;;  %v4375_v2 = vadd.f32 %v1932_v35, %v1619_v6  ;;  %v2139_v19 = vmul.f32 %v4095_v45, %v2123_v43  ;;  %v2140_v38 = vmul.f32 %v4098_v50, %v2124_v59 }
 0x4a0   : > { %v1936_v51 = vpop.f32.mrf.mxu1  ;;  %v1627_v6 = vadd.f32 %v1626_v37, %v4271_v9 }
 0x4a1   : > { %v3259_v31 = vpop.eup %3258  ;;  %v2787_v32 = vmul.bf16 3216621497, %v1967_v16  ;;  %v2154_v46 = vpack.c.bf16 %v2140_v38, %v2139_v19  ;;  %v1959_v4 = vadd.f32 %v1936_v51, %v1623_v36 }
 0x4a2   : > { %v3261_v52 = vpop.eup %3260  ;;  %v2005_v42 = vadd.bf16 1065369472, %v3259_v31  ;;  %v1938_v35 = vpop.f32.mrf.mxu1 }
 0x4a3   : > { %3266 = vpow.bf16 %v2787_v32  ;;  %v4384_v44 = vadd.f32 %v1938_v35, %v1625_v39  ;;  %2956 = vmatmul.mubr.bf16.vlgmr.msra.gmra.mxu0 %v2154_v46  ;;  %v2014_v43 = vmul.bf16 1065369472, %v3261_v52 }
 0x4a4   : > { %3268 = vrcp.bf16 %v2005_v42  ;;  %v1940_v59 = vpop.f32.mrf.mxu1 }
 0x4a5   : > { %v1960_v14 = vadd.f32 %v1940_v59, %v1627_v6  ;;  %v2125_v27 = vunpack.c.l.bf16 %v2014_v43  ;;  %v2126_v16 = vunpack.c.h.bf16 %v2014_v43 }
 0x4a7   : > { %v1968_v41 = vpack.c.bf16 %v1960_v14, %v1959_v4  ;;  %v2141_v19 = vmul.f32 %v4104_v53, %v2125_v27  ;;  %v2142_v3 = vmul.f32 %v4107_v34, %v2126_v16 }
 0x4a9   : > { %v3263_v38 = vpop.eup %3262  ;;  %v2788_v31 = vmul.bf16 3216621497, %v1968_v41  ;;  %v2155_v37 = vpack.c.bf16 %v2142_v3, %v2141_v19 }
 0x4aa   : > { %v3265_v40 = vpop.eup %3264  ;;  %v2006_v9 = vadd.bf16 1065369472, %v3263_v38 }
 0x4ab   : > { %3270 = vpow.bf16 %v2788_v31  ;;  %2959 = vmatprep.mubr.bf16.mxu0 %v2155_v37  ;;  %v2016_v39 = vmul.bf16 1065369472, %v3265_v40 }
 0x4ac   : > { %3272 = vrcp.bf16 %v2006_v9 }
 0x4ad   : > { %v2127_v32 = vunpack.c.l.bf16 %v2016_v39  ;;  %v2128_v46 = vunpack.c.h.bf16 %v2016_v39 }
 0x4af   : > { %v2143_v51 = vmul.f32 %v4113_v55, %v2127_v32  ;;  %v2144_v52 = vmul.f32 %v4116_v56, %v2128_v46 }
 0x4b1   : > { %v3267_v36 = vpop.eup %3266  ;;  %v2156_v6 = vpack.c.bf16 %v2144_v52, %v2143_v51 }
 0x4b2   : > { %v3269_v42 = vpop.eup %3268  ;;  %v2007_v35 = vadd.bf16 1065369472, %v3267_v36 }
 0x4b3   : > { %v2018_v43 = vmul.bf16 1065369472, %v3269_v42  ;;  %2960 = vmatmul.mubr.bf16.gmra.mxu0 %v2156_v6 }
 0x4b4   : > { %3274 = vrcp.bf16 %v2007_v35 }
 0x4b5   : > { %v2129_v41 = vunpack.c.l.bf16 %v2018_v43  ;;  %v2130_v59 = vunpack.c.h.bf16 %v2018_v43 }
 0x4b7   : > { %v2145_v4 = vmul.f32 %v4122_v0, %v2129_v41  ;;  %v2146_v14 = vmul.f32 %v4125_v60, %v2130_v59  ;;  %v4587_v59 = vpack.c.bf16 %v4307_v22, %v4300_v10  ;;  %v1385_v22 = vsub.s32 2, %v3862_v29 }
 0x4b9   : > { %v3271_v40 = vpop.eup %3270  ;;  %v2157_v27 = vpack.c.bf16 %v2146_v14, %v2145_v4  ;;  %v2790_v4 = vmul.bf16 3216621497, %v4587_v59  ;;  %v4589_v14 = vpack.c.bf16 %v4338_v30, %v4334_v13 }
 0x4ba   : > { %v3273_v16 = vpop.eup %3272  ;;  %v2008_v19 = vadd.bf16 1065369472, %v3271_v40 }
 0x4bb   : > { %2963 = vmatprep.mubr.bf16.mxu0 %v2157_v27  ;;  %v2020_v3 = vmul.bf16 1065369472, %v3273_v16  ;;  %v2792_v40 = vmul.bf16 3216621497, %v4589_v14 }
 0x4bc   : > { %3276 = vrcp.bf16 %v2008_v19 }
 0x4bd   : > { %v2131_v38 = vunpack.c.l.bf16 %v2020_v3  ;;  %v2132_v31 = vunpack.c.h.bf16 %v2020_v3  ;;  %3278 = vpow.bf16 %v2790_v4 }
 0x4bf   : > { %v2147_v9 = vmul.f32 %v4131_v62, %v2131_v38  ;;  %v2148_v37 = vmul.f32 %v4134_v25, %v2132_v31 }
 0x4c1   : > { %v2158_v39 = vpack.c.bf16 %v2148_v37, %v2147_v9 }
 0x4c2   : > { %v3275_v32 = vpop.eup %3274 }
 0x4c3   : > { %2964 = vmatmul.mubr.bf16.gmra.mxu0 %v2158_v39  ;;  %v2022_v46 = vmul.bf16 1065369472, %v3275_v32 }
 0x4c5   : > { %v2133_v0 = vunpack.c.l.bf16 %v2022_v46  ;;  %v2134_v51 = vunpack.c.h.bf16 %v2022_v46  ;;  %v1942_v46 = vpop.f32.mrf.mxu1 }
 0x4c7   : > { %v2149_v60 = vmul.f32 %v4140_v1, %v2133_v0  ;;  %v2150_v52 = vmul.f32 %v4143_v47, %v2134_v51  ;;  %v4588_v1 = vpack.c.bf16 %v4287_v63, %v4280_v20  ;;  %v1628_v63 = vpop.f32.mrf.mxu0  ;;  %v4412_v20 = vrot.slane %v4253_v5, %v1385_v22 }
 0x4c8   : > { %v1629_v0 = vadd.f32 %v1628_v63, %v4262_v7 }
 0x4c9   : > { %v2159_v36 = vpack.c.bf16 %v2150_v52, %v2149_v60  ;;  %v2789_v47 = vmul.bf16 3216621497, %v4588_v1  ;;  %v1674_v3 = vadd.f32 %v4184_v11, %v4412_v20  ;;  %v1666_v29 = vadd.f32 %v4188_v24, %v4412_v20 }
 0x4ca   : > { %v3277_v42 = vpop.eup %3276  ;;  %v1669_v5 = vadd.f32 %v4196_v48, %v4412_v20  ;;  %v4592_v11 = vpack.c.bf16 %v4352_v21, %v4348_v8  ;;  %v2040_v52 = vadd.f32 %v1942_v46, %v1629_v0  ;;  %v1690_v14 = vadd.f32 %v4200_v26, %v4412_v20 }
 0x4cb   : > { %2967 = vmatprep.mubr.bf16.mxu0 %v2159_v36  ;;  %v2024_v35 = vmul.bf16 1065369472, %v3277_v42  ;;  %3280 = vpow.bf16 %v2789_v47  ;;  %v3279_v27 = vpop.eup %3278  ;;  %v4429_v42 = vpop.permute.xlu1 %2457  ;;  %v1685_v22 = vadd.f32 %v4212_v15, %v4412_v20 }
 0x4cc   : > { %v2082_v19 = vadd.bf16 1065369472, %v3279_v27  ;;  %3282 = vpow.bf16 %v2792_v40  ;;  %v2793_v32 = vmul.bf16 3216621497, %v4592_v11  ;;  %v2048_v21 = vpack.c.bf16 %v2040_v52, %v4384_v44 }
 0x4cd   : > { %v2135_v6 = vunpack.c.l.bf16 %v2024_v35  ;;  %v2136_v43 = vunpack.c.h.bf16 %v2024_v35  ;;  %v1682_v40 = vadd.f32 %v4204_v28, %v4412_v20  ;;  %v1693_v44 = vadd.f32 %v4208_v33, %v4412_v20 }
 0x4ce   : > { %v4593_v27 = vpack.c.bf16 %v4375_v2, %v4372_v61 }
 0x4cf   : > { %v2151_v62 = vmul.f32 %v4149_v58, %v2135_v6  ;;  %v2152_v25 = vmul.f32 %v4152_v49, %v2136_v43  ;;  %v4590_v58 = vpack.c.bf16 %v4324_v17, %v4320_v57  ;;  %v1677_v57 = vadd.f32 %v4192_v23, %v4412_v20  ;;  %v2463_v43 = vpop.permute.xlu1 %2462 }
 0x4d0   : > { %v4591_v17 = vpack.c.bf16 %v4363_v54, %v4360_v12 }
 0x4d1   : > { %v2160_v41 = vpack.c.bf16 %v2152_v25, %v2151_v62  ;;  %v2791_v49 = vmul.bf16 3216621497, %v4590_v58  ;;  %v2796_v62 = vmul.bf16 3216621497, %v2048_v21  ;;  %v2795_v58 = vmul.bf16 3216621497, %v4593_v27  ;;  %v2453_v21 = vpop.permute.xlu0 %2452 }
 0x4d2   : > { %v2794_v38 = vmul.bf16 3216621497, %v4591_v17 }
 0x4d3   : > { %2968 = vmatmul.mubr.bf16.gmra.mxu0 %v2160_v41  ;;  %3284 = vpow.bf16 %v2791_v49  ;;  %v2468_v63 = vpop.permute.xlu1 %2467 }
 0x4d4   : > { %3286 = vrcp.bf16 %v2082_v19 }
 0x4d9   : > { %v3281_v16 = vpop.eup %3280 }
 0x4da   : > { %v2081_v10 = vadd.bf16 1065369472, %v3281_v16  ;;  %v3283_v39 = vpop.eup %3282 }
 0x4db   : > { %v2084_v24 = vadd.bf16 1065369472, %v3283_v39 }
 0x4dc   : > { %3288 = vrcp.bf16 %v2081_v10 }
 0x4dd   : > { %3290 = vpow.bf16 %v2794_v38 }
 0x4e1   : > { %v3285_v60 = vpop.eup %3284 }
 0x4e2   : > { %v3287_v36 = vpop.eup %3286  ;;  %v2083_v35 = vadd.bf16 1065369472, %v3285_v60 }
 0x4e3   : > { %v2092_v7 = vmul.bf16 1065369472, %v3287_v36 }
 0x4e5   : > { %v2107_v25 = vunpack.c.l.bf16 %v2092_v7  ;;  %v2108_v41 = vunpack.c.h.bf16 %v2092_v7 }
 0x4e7   : > { %v2372_v49 = vsub.f32 1.0, %v2107_v25  ;;  %v2373_v16 = vsub.f32 1.0, %v2108_v41 }
 0x4e9   : > { %v2388_v15 = vmul.f32 %v4095_v45, %v2372_v49 }
 0x4ea   : > { %v3289_v8 = vpop.eup %3288 }
 0x4eb   : > { %v2090_v6 = vmul.bf16 1065369472, %v3289_v8  ;;  %v3291_v10 = vpop.eup %3290 }
 0x4ed   : > { %v2105_v1 = vunpack.c.l.bf16 %v2090_v6  ;;  %v2106_v47 = vunpack.c.h.bf16 %v2090_v6 }
 0x563   : > { %v2957_v13 = vpop.f32.mrf.mxu0 }
 0x564   : > { %v2324_v9 = vadd.f32 %v2957_v13, %v1674_v3  ;;  %v2370_v3 = vsub.f32 1.0, %v2105_v1 }
 0x565   : > { %v2259_v30 = vpop.f32.mrf.mxu0 }
 0x566   : > { %v2322_v12 = vadd.f32 %v2259_v30, %v1666_v29  ;;  %v2386_v60 = vmul.f32 %v4086_v18, %v2370_v3 }
 0x567   : > { %v2958_v31 = vpop.f32.mrf.mxu0 }
 0x568   : > { %v2325_v37 = vadd.f32 %v2958_v31, %v1677_v57  ;;  %v2371_v57 = vsub.f32 1.0, %v2106_v47 }
 0x569   : > { %v2262_v23 = vpop.f32.mrf.mxu0 }
 0x56a   : > { %v2339_v54 = vpack.c.bf16 %v2325_v37, %v2324_v9  ;;  %v2323_v51 = vadd.f32 %v2262_v23, %v1669_v5  ;;  %v2086_v5 = vadd.bf16 1065369472, %v3291_v10  ;;  %v2389_v9 = vmul.f32 %v4098_v50, %v2373_v16  ;;  %v4594_v50 = vld [vmem:[#allocation15_spill] sm:$0xff] }
 0x56c   : > { %3292 = vtanh.bf16 %v2339_v54  ;;  %v2338_v48 = vpack.c.bf16 %v2323_v51, %v2322_v12  ;;  %v4448_v51 = vpop.permute.xlu1 %2472 }
 0x56d   : > { %3294 = vpow.bf16 %v2793_v32 }
 0x56e   : > { %3296 = vtanh.bf16 %v2338_v48 }
 0x56f   : > { %3298 = vrcp.bf16 %v2084_v24  ;;  %v2387_v24 = vmul.f32 %v4594_v50, %v2371_v57 }
 0x570   : > { %3300 = vrcp.bf16 %v2083_v35 }
 0x571   : > { %3302 = vpow.bf16 %v2796_v62 }
 0x572   : > { %3304 = vpow.bf16 %v2795_v58 }
 0x573   : > { %v2961_v59 = vpop.f32.mrf.mxu0 }
 0x574   : > { %v2328_v26 = vadd.f32 %v2961_v59, %v1690_v14  ;;  %v4595_v14 = vld [vmem:[#allocation16_spill] sm:$0xff] }
 0x575   : > { %v2275_v4 = vpop.f32.mrf.mxu0 }
 0x576   : > { %v2326_v28 = vadd.f32 %v2275_v4, %v1682_v40  ;;  %v1706_v40 = vadd.f32 %v4595_v14, %v4412_v20  ;;  %v4601_v14 = vld [vmem:[#allocation21_spill] sm:$0xff] }
 0x577   : > { %v2962_v19 = vpop.f32.mrf.mxu0 }
 0x578   : > { %v2329_v13 = vadd.f32 %v2962_v19, %v1693_v44  ;;  %v4596_v44 = vld [vmem:[#allocation18_spill] sm:$0xff]  ;;  %v4597_v19 = vld [vmem:[#allocation17_spill] sm:$0xff] }
 0x579   : > { %v2278_v33 = vpop.f32.mrf.mxu0  ;;  %v1709_v27 = vadd.f32 %v4596_v44, %v4412_v20  ;;  %v1698_v10 = vadd.f32 %v4597_v19, %v4412_v20 }
 0x57a   : > { %v3293_v30 = vpop.eup %3292  ;;  %v2341_v38 = vpack.c.bf16 %v2329_v13, %v2328_v26  ;;  %v2327_v31 = vadd.f32 %v2278_v33, %v1685_v22 }
 0x57b   : > { %v3295_v61 = vpop.eup %3294  ;;  %v2356_v2 = vunpack.c.l.bf16 %v3293_v30  ;;  %v2357_v17 = vunpack.c.h.bf16 %v3293_v30 }
 0x57c   : > { %v3297_v29 = vpop.eup %3296  ;;  %3306 = vtanh.bf16 %v2341_v38  ;;  %v2340_v11 = vpack.c.bf16 %v2327_v31, %v2326_v28  ;;  %v2085_v46 = vadd.bf16 1065369472, %v3295_v61 }
 0x57d   : > { %v2404_v37 = vmul.f32 %v2356_v2, %v2107_v25  ;;  %v2405_v39 = vmul.f32 %v2357_v17, %v2108_v41  ;;  %v3299_v32 = vpop.eup %3298  ;;  %v2354_v23 = vunpack.c.l.bf16 %v3297_v29  ;;  %v2355_v0 = vunpack.c.h.bf16 %v3297_v29 }
 0x57e   : > { %3308 = vtanh.bf16 %v2340_v11  ;;  %v3301_v45 = vpop.eup %3300  ;;  %v2096_v8 = vmul.bf16 1065369472, %v3299_v32 }
 0x57f   : > { %v2420_v12 = vadd.f32 %v2404_v37, %v2388_v15  ;;  %v2421_v54 = vadd.f32 %v2405_v39, %v2389_v9  ;;  %3310 = vrcp.bf16 %v2086_v5  ;;  %v2402_v52 = vmul.f32 %v2354_v23, %v2105_v1 }
 0x580   : > { %v2403_v48 = vmul.f32 %v2355_v0, %v2106_v47  ;;  %3312 = vrcp.bf16 %v2085_v46  ;;  %v2094_v62 = vmul.bf16 1065369472, %v3301_v45  ;;  %v2111_v59 = vunpack.c.l.bf16 %v2096_v8  ;;  %v3303_v47 = vpop.eup %3302 }
 0x581   : > { %v2532_v36 = vmul.f32 %v2463_v43, %v2420_v12  ;;  %v2533_v35 = vmul.f32 %v2468_v63, %v2421_v54  ;;  %v2418_v7 = vadd.f32 %v2402_v52, %v2386_v60  ;;  %v2478_v43 = vpop.permute.xlu1 %2477  ;;  %v2112_v4 = vunpack.c.h.bf16 %v2096_v8  ;;  %v3305_v3 = vpop.eup %3304 }
 0x582   : > { %v2419_v6 = vadd.f32 %v2403_v48, %v2387_v24  ;;  %v2109_v58 = vunpack.c.l.bf16 %v2094_v62  ;;  %v2110_v49 = vunpack.c.h.bf16 %v2094_v62  ;;  %v2088_v13 = vadd.bf16 1065369472, %v3303_v47 }
 0x583   : > { %2548 = vst [vmem:[%s4452_s29 + $0x10] sm:$0xff] %v2532_v36  ;;  %2549 = vst [vmem:[%s4452_s29 + $0x18] sm:$0xff] %v2533_v35  ;;  %v2965_v18 = vpop.f32.mrf.mxu0  ;;  %v2530_v25 = vmul.f32 %v2453_v21, %v2418_v7  ;;  %v2376_v30 = vsub.f32 1.0, %v2111_v59  ;;  %v2377_v28 = vsub.f32 1.0, %v2112_v4  ;;  %v2087_v39 = vadd.bf16 1065369472, %v3305_v3 }
 0x584   : > { %v2531_v41 = vmul.f32 %v4429_v42, %v2419_v6  ;;  %v4598_v42 = vld [vmem:[#allocation19_spill] sm:$0xff]  ;;  %v2332_v63 = vadd.f32 %v2965_v18, %v1706_v40  ;;  %v2374_v38 = vsub.f32 1.0, %v2109_v58  ;;  %v2375_v31 = vsub.f32 1.0, %v2110_v49 }
 0x585   : > { %v2291_v1 = vpop.f32.mrf.mxu0  ;;  %2546 = vst [vmem:[%s4452_s29] sm:$0xff] %v2530_v25  ;;  %v1701_v22 = vadd.f32 %v4598_v42, %v4412_v20  ;;  %v2483_v29 = vpop.permute.xlu1 %2482  ;;  %v2392_v11 = vmul.f32 %v4113_v55, %v2376_v30  ;;  %v2393_v32 = vmul.f32 %v4116_v56, %v2377_v28  ;;  %v1714_v40 = vadd.f32 %v4601_v14, %v4412_v20 }
 0x586   : > { %2547 = vst [vmem:[%s4452_s29 + $0x8] sm:$0xff] %v2531_v41  ;;  %v2330_v57 = vadd.f32 %v2291_v1, %v1698_v10  ;;  %v2390_v60 = vmul.f32 %v4104_v53, %v2374_v38  ;;  %v2391_v45 = vmul.f32 %v4107_v34, %v2375_v31  ;;  %v4600_v1 = vld [vmem:[#allocation22_spill] sm:$0xff]  ;;  %v3342_v38 = vld [vmem:[%s3721_s26 + $0x50] sm:$0xff] }
 0x587   : > { %v2966_v16 = vpop.f32.mrf.mxu0  ;;  %v1725_v47 = vadd.f32 %v4600_v1, %v4412_v20 }
 0x588   : > { %v2333_v26 = vadd.f32 %v2966_v16, %v1709_v27 }
 0x589   : > { %v2294_v33 = vpop.f32.mrf.mxu0  ;;  %v2488_v55 = vpop.permute.xlu1 %2487 }
 0x58a   : > { %v2343_v61 = vpack.c.bf16 %v2333_v26, %v2332_v63  ;;  %v2331_v2 = vadd.f32 %v2294_v33, %v1701_v22  ;;  %v3307_v17 = vpop.eup %3306 }
 0x58b   : > { %v2360_v5 = vunpack.c.l.bf16 %v3307_v17  ;;  %v2361_v15 = vunpack.c.h.bf16 %v3307_v17 }
 0x58c   : > { %3314 = vtanh.bf16 %v2343_v61  ;;  %v2342_v9 = vpack.c.bf16 %v2331_v2, %v2330_v57  ;;  %v3309_v37 = vpop.eup %3308 }
 0x58d   : > { %3316 = vrcp.bf16 %v2088_v13  ;;  %v3311_v46 = vpop.eup %3310  ;;  %v2358_v23 = vunpack.c.l.bf16 %v3309_v37  ;;  %v2359_v0 = vunpack.c.h.bf16 %v3309_v37  ;;  %v2408_v12 = vmul.f32 %v2360_v5, %v2111_v59  ;;  %v4599_v59 = vld [vmem:[#allocation20_spill] sm:$0xff]  ;;  %v2493_v63 = vpop.permute.xlu1 %2492 }
 0x58e   : > { %v2409_v54 = vmul.f32 %v2361_v15, %v2112_v4  ;;  %3318 = vtanh.bf16 %v2342_v9  ;;  %v3313_v50 = vpop.eup %3312  ;;  %v2100_v56 = vmul.bf16 1065369472, %v3311_v46  ;;  %v1722_v4 = vadd.f32 %v4599_v59, %v4412_v20  ;;  %v2498_v13 = vpop.permute.xlu0 %2497 }
 0x58f   : > { %v2406_v24 = vmul.f32 %v2358_v23, %v2109_v58  ;;  %v2407_v52 = vmul.f32 %v2359_v0, %v2110_v49  ;;  %v2424_v48 = vadd.f32 %v2408_v12, %v2392_v11  ;;  %3320 = vrcp.bf16 %v2087_v39 }
 0x590   : > { %v2425_v36 = vadd.f32 %v2409_v54, %v2393_v32  ;;  %v2098_v6 = vmul.bf16 1065369472, %v3313_v50  ;;  %v2115_v25 = vunpack.c.l.bf16 %v2100_v56  ;;  %v2116_v41 = vunpack.c.h.bf16 %v2100_v56  ;;  %v3344_v32 = vld [vmem:[%s3721_s26 + $0x40] sm:$0xff]  ;;  %v3345_v54 = vld [vmem:[%s3721_s26 + $0x48] sm:$0xff] }
 0x591   : > { %v2422_v35 = vadd.f32 %v2406_v24, %v2390_v60  ;;  %v2423_v8 = vadd.f32 %v2407_v52, %v2391_v45  ;;  %v2536_v21 = vmul.f32 %v2483_v29, %v2424_v48  ;;  %v3343_v29 = vld [vmem:[%s3721_s26 + $0x58] sm:$0xff]  ;;  %v2503_v12 = vpop.permute.xlu1 %2502 }
 0x592   : > { %v2537_v7 = vmul.f32 %v2488_v55, %v2425_v36  ;;  %v2113_v44 = vunpack.c.l.bf16 %v2098_v6  ;;  %v2114_v49 = vunpack.c.h.bf16 %v2098_v6  ;;  %v2380_v10 = vsub.f32 1.0, %v2115_v25  ;;  %v2508_v24 = vpop.permute.xlu0 %2507 }
 0x593   : > { %v2969_v53 = vpop.f32.mrf.mxu0  ;;  %v2534_v34 = vmul.f32 %v4448_v51, %v2422_v35  ;;  %v2535_v62 = vmul.f32 %v2478_v43, %v2423_v8  ;;  %2552 = vst [vmem:[%s4452_s29 + $0x30] sm:$0xff] %v2536_v21  ;;  %v4602_v51 = vld [vmem:[#allocation23_spill] sm:$0xff]  ;;  %v2381_v42 = vsub.f32 1.0, %v2116_v41 }
 0x594   : > { %2553 = vst [vmem:[%s4452_s29 + $0x38] sm:$0xff] %v2537_v7  ;;  %v1717_v43 = vadd.f32 %v4602_v51, %v4412_v20  ;;  %v2336_v58 = vadd.f32 %v2969_v53, %v1722_v4  ;;  %v2378_v3 = vsub.f32 1.0, %v2113_v44  ;;  %v2379_v20 = vsub.f32 1.0, %v2114_v49  ;;  %v3347_v51 = vld [vmem:[%s3721_s26 + $0x78] sm:$0xff] }
 0x595   : > { %v2307_v18 = vpop.f32.mrf.mxu0  ;;  %2550 = vst [vmem:[%s4452_s29 + $0x20] sm:$0xff] %v2534_v34  ;;  %2551 = vst [vmem:[%s4452_s29 + $0x28] sm:$0xff] %v2535_v62  ;;  %v2396_v31 = vmul.f32 %v3342_v38, %v2380_v10  ;;  %v2397_v5 = vmul.f32 %v3343_v29, %v2381_v42  ;;  %v3348_v10 = vld [vmem:[%s3721_s26 + $0x60] sm:$0xff] }
 0x596   : > { %v2334_v26 = vadd.f32 %v2307_v18, %v1714_v40  ;;  %v2394_v46 = vmul.f32 %v3344_v32, %v2378_v3  ;;  %v2395_v60 = vmul.f32 %v3345_v54, %v2379_v20  ;;  %v2518_v59 = vpop.permute.xlu0 %2517 }
 0x597   : > { %v2970_v27 = vpop.f32.mrf.mxu0 }
 0x598   : > { %v2337_v16 = vadd.f32 %v2970_v27, %v1725_v47 }
 0x599   : > { %v2310_v19 = vpop.f32.mrf.mxu0 }
 0x59a   : > { %v3315_v22 = vpop.eup %3314  ;;  %v2345_v30 = vpack.c.bf16 %v2337_v16, %v2336_v58  ;;  %v2335_v28 = vadd.f32 %v2310_v19, %v1717_v43  ;;  %v2528_v3 = vpop.permute.xlu0 %2527 }
 0x59b   : > { %v3317_v33 = vpop.eup %3316  ;;  %v2364_v57 = vunpack.c.l.bf16 %v3315_v22  ;;  %v2365_v61 = vunpack.c.h.bf16 %v3315_v22  ;;  %v3349_v22 = vld [vmem:[%s3721_s26 + $0x68] sm:$0xff] }
 0x59c   : > { %3322 = vtanh.bf16 %v2345_v30  ;;  %v2344_v2 = vpack.c.bf16 %v2335_v28, %v2334_v26  ;;  %v3319_v17 = vpop.eup %3318  ;;  %v2104_v52 = vmul.bf16 1065369472, %v3317_v33 }
 0x59d   : > { %v2412_v15 = vmul.f32 %v2364_v57, %v2115_v25  ;;  %v2413_v9 = vmul.f32 %v2365_v61, %v2116_v41  ;;  %v2362_v37 = vunpack.c.l.bf16 %v3319_v17  ;;  %v2363_v39 = vunpack.c.h.bf16 %v3319_v17  ;;  %v3321_v11 = vpop.eup %3320  ;;  %v2513_v41 = vpop.permute.xlu1 %2512 }
 0x59e   : > { %3324 = vtanh.bf16 %v2344_v2  ;;  %v2102_v35 = vmul.bf16 1065369472, %v3321_v11  ;;  %v2119_v7 = vunpack.c.l.bf16 %v2104_v52  ;;  %v2120_v53 = vunpack.c.h.bf16 %v2104_v52 }
 0x59f   : > { %v2428_v23 = vadd.f32 %v2412_v15, %v2396_v31  ;;  %v2429_v0 = vadd.f32 %v2413_v9, %v2397_v5  ;;  %v2410_v45 = vmul.f32 %v2362_v37, %v2113_v44  ;;  %v2411_v50 = vmul.f32 %v2363_v39, %v2114_v49  ;;  %v3346_v44 = vld [vmem:[%s3721_s26 + $0x70] sm:$0xff] }
 0x5a0   : > { %v2117_v6 = vunpack.c.l.bf16 %v2102_v35  ;;  %v2118_v34 = vunpack.c.h.bf16 %v2102_v35  ;;  %v2384_v62 = vsub.f32 1.0, %v2119_v7  ;;  %v2385_v18 = vsub.f32 1.0, %v2120_v53 }
 0x5a1   : > { %v2540_v48 = vmul.f32 %v2503_v12, %v2428_v23  ;;  %v2541_v36 = vmul.f32 %v2508_v24, %v2429_v0  ;;  %v2426_v55 = vadd.f32 %v2410_v45, %v2394_v46  ;;  %v2427_v56 = vadd.f32 %v2411_v50, %v2395_v60  ;;  %v2523_v33 = vpop.permute.xlu1 %2522 }
 0x5a2   : > { %v2382_v4 = vsub.f32 1.0, %v2117_v6  ;;  %v2383_v1 = vsub.f32 1.0, %v2118_v34  ;;  %v2400_v27 = vmul.f32 %v3346_v44, %v2384_v62  ;;  %v2401_v43 = vmul.f32 %v3347_v51, %v2385_v18 }
 0x5a3   : > { %2556 = vst [vmem:[%s4452_s29 + $0x50] sm:$0xff] %v2540_v48  ;;  %2557 = vst [vmem:[%s4452_s29 + $0x58] sm:$0xff] %v2541_v36  ;;  %v2538_v8 = vmul.f32 %v2493_v63, %v2426_v55  ;;  %v2539_v21 = vmul.f32 %v2498_v13, %v2427_v56 }
 0x5a4   : > { %v2398_v42 = vmul.f32 %v3348_v10, %v2382_v4  ;;  %v2399_v63 = vmul.f32 %v3349_v22, %v2383_v1 }
 0x5a5   : > { %2554 = vst [vmem:[%s4452_s29 + $0x40] sm:$0xff] %v2538_v8  ;;  %2555 = vst [vmem:[%s4452_s29 + $0x48] sm:$0xff] %v2539_v21 }
 0x5aa   : > { %v3323_v25 = vpop.eup %3322 }
 0x5ab   : > { %v2368_v47 = vunpack.c.l.bf16 %v3323_v25  ;;  %v2369_v14 = vunpack.c.h.bf16 %v3323_v25 }
 0x5ac   : > { %v3325_v40 = vpop.eup %3324 }
 0x5ad   : > { %v2366_v58 = vunpack.c.l.bf16 %v3325_v40  ;;  %v2367_v49 = vunpack.c.h.bf16 %v3325_v40  ;;  %v2416_v16 = vmul.f32 %v2368_v47, %v2119_v7  ;;  %v2417_v19 = vmul.f32 %v2369_v14, %v2120_v53 }
 0x5af   : > { %v2414_v26 = vmul.f32 %v2366_v58, %v2117_v6  ;;  %v2415_v13 = vmul.f32 %v2367_v49, %v2118_v34  ;;  %v2432_v30 = vadd.f32 %v2416_v16, %v2400_v27  ;;  %v2433_v28 = vadd.f32 %v2417_v19, %v2401_v43 }
 0x5b1   : > { %v2430_v57 = vadd.f32 %v2414_v26, %v2398_v42  ;;  %v2431_v61 = vadd.f32 %v2415_v13, %v2399_v63  ;;  %v2544_v20 = vmul.f32 %v2523_v33, %v2432_v30  ;;  %v2545_v2 = vmul.f32 %v2528_v3, %v2433_v28 }
 0x5b3   : > { %v2542_v17 = vmul.f32 %v2513_v41, %v2430_v57  ;;  %v2543_v38 = vmul.f32 %v2518_v59, %v2431_v61  ;;  %2560 = vst [vmem:[%s4452_s29 + $0x70] sm:$0xff] %v2544_v20  ;;  %2561 = vst [vmem:[%s4452_s29 + $0x78] sm:$0xff] %v2545_v2 }
 0x5b5   : > { %2558 = vst [vmem:[%s4452_s29 + $0x60] sm:$0xff] %v2542_v17  ;;  %2559 = vst [vmem:[%s4452_s29 + $0x68] sm:$0xff] %v2543_v38 }
 0x5b6   : > { %3467 = shalt.err (!%p3464_p13)
}
 0x5b7   : > { %s3468_s4 = scalar_lea.hbm %s4501_s12, 2048  ;;  %s3472_s11 = scalar_lea.hbm %s4561_s10, 16384 }
 0x5b8   : > { %p3469_p8 = scmp.ne.s32.totalorder %s4501_s12, %s3468_s4  ;;  %p3473_p1 = scmp.lt.s32.totalorder %s4501_s12, %s4561_s10 }
 0x5b9   : > { %p3474_p12 = scmp.lt.s32.totalorder %s3472_s11, %s3468_s4 }
 0x5ba   : > { %p3470_p11 = pnand %p3469_p8, %p3635_p5 }
 0x5bb   : > { %p3475_p10 = por %p3474_p12, %p3473_p1 }
 0x5bc   : > { %p3471_p0 = pneg %p3470_p11 }
 0x5be   : > { %p3476_p3 = pnand %p3475_p10, %p3471_p0 }
 0x5c0   : > { %3479 = shalt.err (!%p3476_p3)
}
 0x5c1   : > { %s3540_s18 = smov 128   ;;  %s3541_s21 = smov 8  }
 0x5c2   : > { %2987 = dma.vmem_to_hbm [thread:$0]  (%p3635_p5), %s4503_s30, 2048, %s4501_s12, %s4511_s17, %s3540_s18, %s3540_s18, %s3541_s21  }
 0x5c3 PF: > { %p3014_p2 = scmp.ge.s32.totalorder %s3526_s16, 2  ;;  %s2591_s25 = sand.u32 1, %s3514_s13  }
 0x5c4   : > { %p4603_p4 = scmp.ne.s32.totalorder %s4567_s24, 0  ;;  %s2592_s28 = scalar_lea.sflag [#allocation4], %s2591_s25 }
 0x5c6   : > { %p3003_p6 = pnand %p3014_p2, %p4603_p4 }
 0x5c8   : > { %p3004_p9 = pneg %p3003_p6 }
 0x5ca   : > { %3509 = dma.done.wait (%p3004_p9), %s2592_s28, 2048  }
 0x5cb   : > { %3511 = vsyncadd (%p3004_p9), %s2592_s28, 4294965248  ;;  %p23_p7 = scmp.ge.s32.totalorder %s3622_s19, 10   ;;  %s4604_s13 = smov %s3518_s14 }
 0x5cc   : > { %s4605_s14 = smov %s3522_s15  ;;  %s4606_s15 = smov %s3633_s22 }
 0x5cd   : > { %s4607_s16 = smov %s3622_s19  ;;  %25 = sbr.rel (!%p23_p7) target bundleno = 8 (0x8), region = 115 }
 0x5d2   :  { %2597 = vsyncpa [#allocation3], 1 }
 0x5d3   :  { %2599 = vsyncpa [#allocation3 + $0x1], 1 }
 0x5d4   :  { %2600 = vsyncpa [#allocation6], 1 }
 0x5d5   :  { %2601 = vsyncpa [#allocation9], 1 }
 0x5d6   :  { %2602 = vsyncpa [#allocation4], 1 }
 0x5d7   :  { %2604 = vsyncpa [#allocation4 + $0x1], 1 }

</bundles_post_ra>
